<compile_context>
chip_gen: v6e
topology: v6e:2x2x1
jax: 0.10.0
libtpu: 0.0.40
codegen_flags: <defaults>
</compile_context>

<pallas_src>
import functools

import numpy as np
import jax
import jax.numpy as jnp
from jax.experimental import pallas as pl
from jax.experimental.pallas import tpu as pltpu


# ---------------------------------------------------------------------------
# Kernel: separable 2-pass FIR on a block of (nb) image planes.
# ---------------------------------------------------------------------------

def _blur_kernel(x_ref, o_ref, hpad_ref, vpad_ref, *, taps, p0, p1, H, W, Ho, Wo):
    nb = x_ref.shape[0]
    nt = len(taps)

    # ---- horizontal pass: zero-pad columns in VMEM, 1-D FIR along lanes ----
    if p0 > 0:
        hpad_ref[:, :, 0:p0] = jnp.zeros((nb, H, p0), jnp.float32)
    if p1 > 0:
        hpad_ref[:, :, p0 + W:p0 + W + p1] = jnp.zeros((nb, H, p1), jnp.float32)
    hpad_ref[:, :, p0:p0 + W] = x_ref[...]

    th = taps[0] * hpad_ref[:, :, 0:Wo]
    for fw in range(1, nt):
        th = th + taps[fw] * hpad_ref[:, :, fw:fw + Wo]

    # ---- vertical pass: zero-pad rows in VMEM, 1-D FIR along sublanes ----
    if p0 > 0:
        vpad_ref[:, 0:p0, :] = jnp.zeros((nb, p0, Wo), jnp.float32)
    if p1 > 0:
        vpad_ref[:, p0 + H:p0 + H + p1, :] = jnp.zeros((nb, p1, Wo), jnp.float32)
    vpad_ref[:, p0:p0 + H, :] = th

    out = taps[0] * vpad_ref[:, 0:Ho, :]
    for fh in range(1, nt):
        out = out + taps[fh] * vpad_ref[:, fh:fh + Ho, :]
    o_ref[...] = out


# ---------------------------------------------------------------------------
# Wrapper
# ---------------------------------------------------------------------------

def _largest_divisor_leq(n, cap):
    cap = max(1, min(n, cap))
    for d in range(cap, 0, -1):
        if n % d == 0:
            return d
    return 1


def blur(x, kernel_1d, pad):
    """Blur.forward: x (B,C,H,W) f32 NCHW, kernel_1d e.g. [1,3,3,1], pad=(p0,p1)>=0."""
    B, C, H, W = x.shape
    p0, p1 = int(pad[0]), int(pad[1])
    assert p0 >= 0 and p1 >= 0, "Blur only uses non-negative pads"

    # 2-D kernel = outer(k,k)/sum(outer) = outer(k/sum, k/sum)  -> separable taps.
    k = np.asarray(kernel_1d, np.float32)
    k = k / k.sum()
    # upfirdn2d_native applies F.conv2d with the flipped kernel -> flipped taps here.
    taps = tuple(float(v) for v in k[::-1])
    kt = len(taps)

    Hp, Wp = H + p0 + p1, W + p0 + p1
    Ho, Wo = Hp - kt + 1, Wp - kt + 1
    assert Ho > 0 and Wo > 0

    N = B * C
    xf = x.reshape(N, H, W)

    # Planes per grid step: big enough to amortize per-step overhead, small enough
    # that double-buffered in/out blocks + scratches fit every generation's VMEM,
    # and >= 4 grid steps so megacore / the pipeline have something to split.
    bytes_per_plane = 4 * (H * W + H * Wp + Hp * Wo + Ho * Wo)
    vmem_budget = 6 * 1024 * 1024
    nb_mem = max(1, vmem_budget // max(bytes_per_plane, 1))
    nb_steps = max(1, N // 4)
    nb = _largest_divisor_leq(N, min(nb_mem, nb_steps))

    kern = functools.partial(_blur_kernel, taps=taps, p0=p0, p1=p1,
                             H=H, W=W, Ho=Ho, Wo=Wo)
    out = pl.pallas_call(
        kern,
        out_shape=jax.ShapeDtypeStruct((N, Ho, Wo), jnp.float32),
        grid=(N // nb,),
        in_specs=[pl.BlockSpec((nb, H, W), lambda i: (i, 0, 0))],
        out_specs=pl.BlockSpec((nb, Ho, Wo), lambda i: (i, 0, 0)),
        scratch_shapes=[pltpu.VMEM((nb, H, Wp), jnp.float32),   # horizontally padded rows
                        pltpu.VMEM((nb, Hp, Wo), jnp.float32)], # vertically padded h-pass result
        compiler_params=pltpu.CompilerParams(dimension_semantics=("parallel",)),
    )(xf)
    return out.reshape(B, C, Ho, Wo)


# ---------------------------------------------------------------------------
# Pure-JAX reference (direct 16-tap form of upfirdn2d_native, up=down=1)
# ---------------------------------------------------------------------------

def blur_reference(x, kernel_1d, pad):
    p0, p1 = int(pad[0]), int(pad[1])
    k = jnp.asarray(kernel_1d, jnp.float32)
    k2 = jnp.outer(k, k)
    k2 = k2 / jnp.sum(k2)
    kf = k2[::-1, ::-1]
    kh, kw = k2.shape
    xp = jnp.pad(x, ((0, 0), (0, 0), (p0, p1), (p0, p1)))
    Ho = xp.shape[2] - kh + 1
    Wo = xp.shape[3] - kw + 1
    out = jnp.zeros(x.shape[:2] + (Ho, Wo), jnp.float32)
    for i in range(kh):
        for j in range(kw):
            out = out + kf[i, j] * xp[:, :, i:i + Ho, j:j + Wo]
    return out


if __name__ == "__main__":
    B, C, H, W = 2, 16, 32, 32
    kernel_1d = [1.0, 3.0, 3.0, 1.0]     # StyleGAN2 blur kernel
    pad = (2, 1)                         # typical Blur pad (upsample path) -> same-size output

    key = jax.random.PRNGKey(0)
    x = jax.random.normal(key, (B, C, H, W), jnp.float32)

    out = blur(x, kernel_1d, pad)
    out = jax.block_until_ready(out)

    ref = blur_reference(x, kernel_1d, pad)
    assert out.shape == ref.shape == (B, C, H, W)
    assert bool(jnp.all(jnp.isfinite(out)))
    assert bool(jnp.allclose(out, ref, atol=1e-5, rtol=1e-5))
    print("KERNEL_OK")
</pallas_src>

<mosaic_0001>
module attributes {stable_mosaic.version = 11 : i64} {
  func.func @_blur_kernel(%arg0: i32, %arg1: memref<8x32x32xf32, #tpu.memory_space<vmem>>, %arg2: memref<8x32x32xf32, #tpu.memory_space<vmem>>, %arg3: memref<8x32x35xf32, #tpu.memory_space<vmem>>, %arg4: memref<8x35x32xf32, #tpu.memory_space<vmem>>) attributes {dimension_semantics = [#tpu.dimension_semantics<parallel>], iteration_bounds = array<i64: 4>, scalar_prefetch = 0 : i64, scratch_operands = 2 : i64, tpu.core_type = #tpu.core_type<tc>, window_params = [{transform_indices = @transform_0, window_bounds = array<i64: 8, 32, 32>}, {transform_indices = @transform_1, window_bounds = array<i64: 8, 32, 32>}]} {
    %cst = arith.constant 0.000000e+00 : f32
    %0 = vector.broadcast %cst : f32 to vector<8x32x2xf32>
    %c0 = arith.constant 0 : index
    %c0_0 = arith.constant 0 : index
    %c0_1 = arith.constant 0 : index
    %1 = vector.load %arg3[%c0, %c0_0, %c0_1] : memref<8x32x35xf32, #tpu.memory_space<vmem>>, vector<8x32x2xf32>
    tpu.vector_store %arg3[%c0, %c0_0, %c0_1], %0 {strides = array<i32>} : memref<8x32x35xf32, #tpu.memory_space<vmem>>, vector<8x32x2xf32>,
    %cst_2 = arith.constant 0.000000e+00 : f32
    %2 = vector.broadcast %cst_2 : f32 to vector<8x32x1xf32>
    %c0_3 = arith.constant 0 : index
    %c0_4 = arith.constant 0 : index
    %c34 = arith.constant 34 : index
    %3 = vector.load %arg3[%c0_3, %c0_4, %c34] : memref<8x32x35xf32, #tpu.memory_space<vmem>>, vector<8x32x1xf32>
    tpu.vector_store %arg3[%c0_3, %c0_4, %c34], %2 {strides = array<i32>} : memref<8x32x35xf32, #tpu.memory_space<vmem>>, vector<8x32x1xf32>,
    %c0_5 = arith.constant 0 : index
    %c0_6 = arith.constant 0 : index
    %c0_7 = arith.constant 0 : index
    %4 = vector.load %arg1[%c0_5, %c0_6, %c0_7] : memref<8x32x32xf32, #tpu.memory_space<vmem>>, vector<8x32x32xf32>
    %c0_8 = arith.constant 0 : index
    %c0_9 = arith.constant 0 : index
    %c2 = arith.constant 2 : index
    %5 = vector.load %arg3[%c0_8, %c0_9, %c2] : memref<8x32x35xf32, #tpu.memory_space<vmem>>, vector<8x32x32xf32>
    tpu.vector_store %arg3[%c0_8, %c0_9, %c2], %4 {strides = array<i32>} : memref<8x32x35xf32, #tpu.memory_space<vmem>>, vector<8x32x32xf32>,
    %c0_10 = arith.constant 0 : index
    %c0_11 = arith.constant 0 : index
    %c0_12 = arith.constant 0 : index
    %6 = vector.load %arg3[%c0_10, %c0_11, %c0_12] : memref<8x32x35xf32, #tpu.memory_space<vmem>>, vector<8x32x32xf32>
    %cst_13 = arith.constant 1.250000e-01 : f32
    %7 = vector.broadcast %cst_13 : f32 to vector<8x32x32xf32>
    %8 = arith.mulf %7, %6 : vector<8x32x32xf32>
    %c0_14 = arith.constant 0 : index
    %c0_15 = arith.constant 0 : index
    %c1 = arith.constant 1 : index
    %9 = vector.load %arg3[%c0_14, %c0_15, %c1] : memref<8x32x35xf32, #tpu.memory_space<vmem>>, vector<8x32x32xf32>
    %cst_16 = arith.constant 3.750000e-01 : f32
    %10 = vector.broadcast %cst_16 : f32 to vector<8x32x32xf32>
    %11 = arith.mulf %10, %9 : vector<8x32x32xf32>
    %12 = arith.addf %8, %11 : vector<8x32x32xf32>
    %c0_17 = arith.constant 0 : index
    %c0_18 = arith.constant 0 : index
    %c2_19 = arith.constant 2 : index
    %13 = vector.load %arg3[%c0_17, %c0_18, %c2_19] : memref<8x32x35xf32, #tpu.memory_space<vmem>>, vector<8x32x32xf32>
    %cst_20 = arith.constant 3.750000e-01 : f32
    %14 = vector.broadcast %cst_20 : f32 to vector<8x32x32xf32>
    %15 = arith.mulf %14, %13 : vector<8x32x32xf32>
    %16 = arith.addf %12, %15 : vector<8x32x32xf32>
    %c0_21 = arith.constant 0 : index
    %c0_22 = arith.constant 0 : index
    %c3 = arith.constant 3 : index
    %17 = vector.load %arg3[%c0_21, %c0_22, %c3] : memref<8x32x35xf32, #tpu.memory_space<vmem>>, vector<8x32x32xf32>
    %cst_23 = arith.constant 1.250000e-01 : f32
    %18 = vector.broadcast %cst_23 : f32 to vector<8x32x32xf32>
    %19 = arith.mulf %18, %17 : vector<8x32x32xf32>
    %20 = arith.addf %16, %19 : vector<8x32x32xf32>
    %cst_24 = arith.constant 0.000000e+00 : f32
    %21 = vector.broadcast %cst_24 : f32 to vector<8x2x32xf32>
    %c0_25 = arith.constant 0 : index
    %c0_26 = arith.constant 0 : index
    %c0_27 = arith.constant 0 : index
    %22 = vector.load %arg4[%c0_25, %c0_26, %c0_27] : memref<8x35x32xf32, #tpu.memory_space<vmem>>, vector<8x2x32xf32>
    tpu.vector_store %arg4[%c0_25, %c0_26, %c0_27], %21 {strides = array<i32>} : memref<8x35x32xf32, #tpu.memory_space<vmem>>, vector<8x2x32xf32>,
    %cst_28 = arith.constant 0.000000e+00 : f32
    %23 = vector.broadcast %cst_28 : f32 to vector<8x1x32xf32>
    %c0_29 = arith.constant 0 : index
    %c34_30 = arith.constant 34 : index
    %c0_31 = arith.constant 0 : index
    %24 = vector.load %arg4[%c0_29, %c34_30, %c0_31] : memref<8x35x32xf32, #tpu.memory_space<vmem>>, vector<8x1x32xf32>
    tpu.vector_store %arg4[%c0_29, %c34_30, %c0_31], %23 {strides = array<i32>} : memref<8x35x32xf32, #tpu.memory_space<vmem>>, vector<8x1x32xf32>,
    %c0_32 = arith.constant 0 : index
    %c2_33 = arith.constant 2 : index
    %c0_34 = arith.constant 0 : index
    %25 = vector.load %arg4[%c0_32, %c2_33, %c0_34] : memref<8x35x32xf32, #tpu.memory_space<vmem>>, vector<8x32x32xf32>
    tpu.vector_store %arg4[%c0_32, %c2_33, %c0_34], %20 {strides = array<i32>} : memref<8x35x32xf32, #tpu.memory_space<vmem>>, vector<8x32x32xf32>,
    %c0_35 = arith.constant 0 : index
    %c0_36 = arith.constant 0 : index
    %c0_37 = arith.constant 0 : index
    %26 = vector.load %arg4[%c0_35, %c0_36, %c0_37] : memref<8x35x32xf32, #tpu.memory_space<vmem>>, vector<8x32x32xf32>
    %cst_38 = arith.constant 1.250000e-01 : f32
    %27 = vector.broadcast %cst_38 : f32 to vector<8x32x32xf32>
    %28 = arith.mulf %27, %26 : vector<8x32x32xf32>
    %c0_39 = arith.constant 0 : index
    %c1_40 = arith.constant 1 : index
    %c0_41 = arith.constant 0 : index
    %29 = vector.load %arg4[%c0_39, %c1_40, %c0_41] : memref<8x35x32xf32, #tpu.memory_space<vmem>>, vector<8x32x32xf32>
    %cst_42 = arith.constant 3.750000e-01 : f32
    %30 = vector.broadcast %cst_42 : f32 to vector<8x32x32xf32>
    %31 = arith.mulf %30, %29 : vector<8x32x32xf32>
    %32 = arith.addf %28, %31 : vector<8x32x32xf32>
    %c0_43 = arith.constant 0 : index
    %c2_44 = arith.constant 2 : index
    %c0_45 = arith.constant 0 : index
    %33 = vector.load %arg4[%c0_43, %c2_44, %c0_45] : memref<8x35x32xf32, #tpu.memory_space<vmem>>, vector<8x32x32xf32>
    %cst_46 = arith.constant 3.750000e-01 : f32
    %34 = vector.broadcast %cst_46 : f32 to vector<8x32x32xf32>
    %35 = arith.mulf %34, %33 : vector<8x32x32xf32>
    %36 = arith.addf %32, %35 : vector<8x32x32xf32>
    %c0_47 = arith.constant 0 : index
    %c3_48 = arith.constant 3 : index
    %c0_49 = arith.constant 0 : index
    %37 = vector.load %arg4[%c0_47, %c3_48, %c0_49] : memref<8x35x32xf32, #tpu.memory_space<vmem>>, vector<8x32x32xf32>
    %cst_50 = arith.constant 1.250000e-01 : f32
    %38 = vector.broadcast %cst_50 : f32 to vector<8x32x32xf32>
    %39 = arith.mulf %38, %37 : vector<8x32x32xf32>
    %40 = arith.addf %36, %39 : vector<8x32x32xf32>
    %c0_51 = arith.constant 0 : index
    %c0_52 = arith.constant 0 : index
    %c0_53 = arith.constant 0 : index
    %41 = vector.load %arg2[%c0_51, %c0_52, %c0_53] : memref<8x32x32xf32, #tpu.memory_space<vmem>>, vector<8x32x32xf32>
    tpu.vector_store %arg2[%c0_51, %c0_52, %c0_53], %40 {strides = array<i32>} : memref<8x32x32xf32, #tpu.memory_space<vmem>>, vector<8x32x32xf32>,
    return
  }
  func.func @transform_0(%arg0: i32) -> (i32, i32, i32) {
    %c0_i32 = arith.constant 0 : i32
    %c0_i32_0 = arith.constant 0 : i32
    %c0_i32_1 = arith.constant 0 : i32
    return %arg0, %c0_i32, %c0_i32_0 : i32, i32, i32
  }
  func.func @transform_1(%arg0: i32) -> (i32, i32, i32) {
    %c0_i32 = arith.constant 0 : i32
    %c0_i32_0 = arith.constant 0 : i32
    %c0_i32_1 = arith.constant 0 : i32
    return %arg0, %c0_i32, %c0_i32_0 : i32, i32, i32
  }
}

</mosaic_0001>

<bundles_post_ra>
// kernel: tpu_custom_call.1
= control target key start
LH: loop header
LB: loop body
LE: loop exit
PB: predicated region body
PF: predicated region fallthrough
CT: control target
= control target key end

     0   :  { %6 = vsyncpa [#allocation5], 0  ;;  %s2653_s0 = inlined_call_operand.hbm [shape: f32[32,32,32], index: 0, kind: input, shape index: {}]   ;;  %s2654_s1 = inlined_call_operand.hbm [shape: f32[32,32,32], index: 1, kind: output, shape index: {}]  }
   0x1   :  { %8 = vsyncpa [#allocation5 + $0x1], 0 }
   0x2   :  { %9 = vsyncpa [#allocation6], 0 }
   0x3   :  { %11 = vsyncpa [#allocation6 + $0x1], 0  ;;  %s1654_s6 = smov 0   ;;  %s1656_s7 = smov 0  }
   0x4   :  { %s1658_s8 = smov 0   ;;  %s1660_s9 = smov 0  }
   0x5 LB: > { %s1675_s10 = sadd.s32 4294967295, %s1631_s9   ;;  %s1464_s11 = sadd.s32 4294967294, %s1631_s9   ;;  %s1631_s9 = sphi %s1660_s9, %s2671_s9   ;;  %s1627_s8 = sphi %s1658_s8, %s2670_s8   ;;  %s1623_s7 = sphi %s1656_s7, %s2669_s7   ;;  %s1619_s6 = sphi %s1654_s6, %s2668_s6  }
   0x6   : > { %s1679_s12 = sadd.s32 1, %s1631_s9   ;;  %s24_s13 = sadd.s32 1, %s1627_s8 }
   0x7   : > { %s21_s14 = ssub.s32 %s1631_s9, %s1679_s12  ;;  %p31_p0 = scmp.ne.s32.totalorder %s1627_s8, %s1623_s7 }
   0x8   : > { %p22_p1 = scmp.eq.s32.totalorder %s21_s14, 0  ;;  %p32_p2 = scmp.eq.s32.totalorder %s1631_s9, 0 }
   0x9   : > { %p37_p3 = scmp.ne.s32.totalorder %s1623_s7, %s1619_s6  ;;  %p38_p4 = scmp.eq.s32.totalorder %s1675_s10, 0 }
   0xa   : > { %s1691_s15 = scalar_select %p22_p1, %s1627_s8, %s24_s13  }
   0xb   : > { %p1693_p5 = por %p32_p2, %p31_p0  ;;  %p1697_p6 = por %p38_p4, %p37_p3 }
   0xc   : > { %p61_p7 = scmp.eq.s32.totalorder %s1675_s10, 3  ;;  %p67_p8 = scmp.eq.s32.totalorder %s1464_s11, 3 }
   0xd   : > { %s2660_s17 = scalar_select %p1697_p6, 1, 0 }
   0xe   : > { %p1496_p9 = scmp.lt.s32.totalorder %s1631_s9, 4  ;;  %p1703_p10 = por %p61_p7, %p31_p0 }
   0xf   : > { %p1707_p11 = por %p67_p8, %p37_p3  ;;  %s87_s20 = sand.u32 1, %s1627_s8  }
  0x10   : > { %s2661_s18 = scalar_select %p1703_p10, 1, 0 }
  0x11   : > { %s2662_s19 = scalar_select %p1707_p11, 1, 0 }
  0x12   : > { %s1481_s21 = sshll.u32 %s1631_s9, 12  ;;  %s1467_s22 = sshll.u32 %s87_s20, 8 }
  0x13   : > { %s1716_s25 = scalar_lea.hbm %s2653_s0, %s1481_s21  ;;  %s91_s26 = scalar_lea.vmem [#allocation4], %s1467_s22 }
  0x14   : > { %s99_s27 = sshll.u32 %s91_s26, 4  ;;  %p1720_p12 = pnand %p1496_p9, %p1693_p5  ;;  %s1724_s27 = int_to_ptr.vmem [resolvable:$true] %s99_s27 }
  0x15   : > { %s1726_s29 = scalar_lea.sflag [#allocation5], %s87_s20  ;;  %s1539_s30 = scalar_lea.hbm %s1716_s25, 4096 }
  0x16   : > { %p1540_p13 = scmp.ne.s32.totalorder %s1716_s25, %s1539_s30  ;;  %p1541_p0 = pneg %p1720_p12 }
  0x17   : > { %s1544_s4 = scalar_lea.hbm %s2653_s0, 16384  ;;  %p1545_p3 = scmp.lt.s32.totalorder %s1716_s25, %s2653_s0 }
  0x18   : > { %p1542_p1 = pnand %p1541_p0, %p1540_p13  ;;  %p1546_p4 = scmp.lt.s32.totalorder %s1544_s4, %s1539_s30 }
  0x1a   : > { %p1543_p2 = pneg %p1542_p1  ;;  %p1547_p5 = por %p1546_p4, %p1545_p3 }
  0x1c   : > { %p1548_p7 = pnand %p1547_p5, %p1543_p2 }
  0x1e   : > { %1551 = shalt.err (!%p1548_p7)
}
  0x1f   : > { %s1552_s13 = scalar_lea.vmem %s1724_s27, 4096  ;;  %s1633_s14 = smov [#allocation4]  }
  0x20   : > { %p1553_p8 = scmp.ne.s32.totalorder %s1724_s27, %s1552_s13  ;;  %s1557_s16 = sshll.u32 %s1633_s14, 4  ;;  %s1558_s16 = int_to_ptr.vmem [resolvable:$false] %s1557_s16 }
  0x21   : > { %s1559_s20 = scalar_lea.vmem %s1558_s16, 8192  ;;  %p1560_p1 = scmp.lt.s32.totalorder %s1724_s27, %s1558_s16 }
  0x22   : > { %p1555_p9 = pnand %p1553_p8, %p1541_p0  ;;  %p1561_p11 = scmp.lt.s32.totalorder %s1559_s20, %s1552_s13 }
  0x24   : > { %p1556_p13 = pneg %p1555_p9  ;;  %p1562_p10 = por %p1561_p11, %p1560_p1 }
  0x26   : > { %p1563_p6 = pnand %p1562_p10, %p1556_p13 }
  0x28   : > { %1566 = shalt.err (!%p1563_p6)
}
  0x29   : > { %s1634_s21 = smov 128   ;;  %s1635_s22 = smov 8  }
  0x2a   : > { %1491 = dma.hbm_to_vmem [thread:$0]  (!%p1720_p12), %s1716_s25, 4096, %s1724_s27, %s1726_s29, %s1634_s21, %s1634_s21, %s1635_s22  }
  0x2b   : > { %p1471_p0 = scmp.ge.s32.totalorder %s1631_s9, 1  ;;  %p107_p2 = scmp.lt.s32.totalorder %s1631_s9, 5 }
  0x2d   : > { %p108_p3 = pnand %p1471_p0, %p107_p2 }
  0x2e   : > { %s1750_s23 = sand.u32 (!%p108_p3), 1, %s1623_s7   ;;  %p2664_p6 = scmp.ne.s32.totalorder (!%p108_p3), %s2660_s17, 0 }
  0x2f   : > { %111 = sbr.rel (%p108_p3) target bundleno = 521 (0x209), region = 24  ;;  %s1472_s24 = sshll.u32 (!%p108_p3), %s1750_s23, 8 }
  0x30   : > { %s114_s26 = scalar_lea.sflag (!%p108_p3), [#allocation5], %s1750_s23  ;;  %s1756_s30 = scalar_lea.vmem (!%p108_p3), [#allocation4], %s1472_s24 }
  0x34   : > { %1610 = dma.done.wait (%p2664_p6), %s114_s26, 4096  }
  0x35   : > { %1612 = vsyncadd (%p2664_p6), %s114_s26, 4294963200  ;;  %vm138_vm0 = vcmask 15360   ;;  %vm171_vm1 = vcmask 285968   ;;  %v2657_v0 = vmov 0.0   ;;  %v204_v1 = vld [vmem:[%s1756_s30] sm:$0xff]  ;;  %v206_v2 = vld [vmem:[%s1756_s30 + $0x10] sm:$0xff] }
  0x36   : > { %139 = vst.msk [vmem:[#allocation2] sm:$0xff] %vm138_vm0, %v2657_v0  ;;  %140 = vst.msk [vmem:[#allocation2 + $0x8] sm:$0xff] %vm138_vm0, %v2657_v0  ;;  %s1637_s17 = smov 2   ;;  %v205_v3 = vld [vmem:[%s1756_s30 + $0x8] sm:$0xff]  ;;  %v207_v4 = vld [vmem:[%s1756_s30 + $0x18] sm:$0xff]  ;;  %vm364_vm2 = vcmask 277520  }
  0x37   : > { %141 = vst.msk [vmem:[#allocation2 + $0x10] sm:$0xff] %vm138_vm0, %v2657_v0  ;;  %142 = vst.msk [vmem:[#allocation2 + $0x18] sm:$0xff] %vm138_vm0, %v2657_v0  ;;  %268 = vrot.lane.b32.xlu0 %v204_v1, %s1637_s17  ;;  %272 = vrot.lane.b32.xlu1 %v206_v2, %s1637_s17  ;;  %v208_v5 = vld [vmem:[%s1756_s30 + $0x20] sm:$0xff]  ;;  %v209_v6 = vld [vmem:[%s1756_s30 + $0x28] sm:$0xff]  ;;  %s1638_s25 = smov 127   ;;  %s1639_s27 = smov 126  }
  0x38   : > { %143 = vst.msk [vmem:[#allocation2 + $0x20] sm:$0xff] %vm138_vm0, %v2657_v0  ;;  %144 = vst.msk [vmem:[#allocation2 + $0x28] sm:$0xff] %vm138_vm0, %v2657_v0  ;;  %v210_v7 = vld [vmem:[%s1756_s30 + $0x30] sm:$0xff]  ;;  %v211_v8 = vld [vmem:[%s1756_s30 + $0x38] sm:$0xff]  ;;  %vm941_vm3 = vcmask 254976   ;;  %vm950_vm4 = vcmask 253952  }
  0x39   : > { %145 = vst.msk [vmem:[#allocation2 + $0x30] sm:$0xff] %vm138_vm0, %v2657_v0  ;;  %146 = vst.msk [vmem:[#allocation2 + $0x38] sm:$0xff] %vm138_vm0, %v2657_v0  ;;  %v212_v9 = vld [vmem:[%s1756_s30 + $0x40] sm:$0xff]  ;;  %v213_v10 = vld [vmem:[%s1756_s30 + $0x48] sm:$0xff]  ;;  %s1640_s28 = smov 125   ;;  %vm959_vm5 = vcmask 261120  }
  0x3a   : > { %147 = vst.msk [vmem:[#allocation2 + $0x40] sm:$0xff] %vm138_vm0, %v2657_v0  ;;  %148 = vst.msk [vmem:[#allocation2 + $0x48] sm:$0xff] %vm138_vm0, %v2657_v0  ;;  %v214_v11 = vld [vmem:[%s1756_s30 + $0x50] sm:$0xff]  ;;  %v215_v12 = vld [vmem:[%s1756_s30 + $0x58] sm:$0xff]  ;;  %s2481_s29 = scalar_lea.vmem [#allocation7], %s1472_s24  ;;  %s1483_s2 = sshll.u32 %s1675_s10, 12 }
  0x3b   : > { %149 = vst.msk [vmem:[#allocation2 + $0x50] sm:$0xff] %vm138_vm0, %v2657_v0  ;;  %150 = vst.msk [vmem:[#allocation2 + $0x58] sm:$0xff] %vm138_vm0, %v2657_v0  ;;  %270 = vrot.lane.b32.xlu0 %v205_v3, %s1637_s17  ;;  %274 = vrot.lane.b32.xlu1 %v207_v4, %s1637_s17  ;;  %v216_v13 = vld [vmem:[%s1756_s30 + $0x60] sm:$0xff]  ;;  %v217_v14 = vld [vmem:[%s1756_s30 + $0x68] sm:$0xff]  ;;  %s1391_s3 = sshll.u32 %s2481_s29, 4  ;;  %s2605_s11 = scalar_lea.hbm %s2654_s1, %s1483_s2  ;;  %s2607_s3 = int_to_ptr.vmem [resolvable:$true] %s1391_s3 }
  0x3c   : > { %151 = vst.msk [vmem:[#allocation2 + $0x60] sm:$0xff] %vm138_vm0, %v2657_v0  ;;  %152 = vst.msk [vmem:[#allocation2 + $0x68] sm:$0xff] %vm138_vm0, %v2657_v0  ;;  %v218_v15 = vld [vmem:[%s1756_s30 + $0x70] sm:$0xff]  ;;  %v219_v16 = vld [vmem:[%s1756_s30 + $0x78] sm:$0xff]  ;;  %s1377_s10 = scalar_lea.sflag [#allocation6], %s1750_s23  ;;  %s1567_s13 = scalar_lea.vmem %s2607_s3, 4096 }
  0x3d   : > { %153 = vst.msk [vmem:[#allocation2 + $0x70] sm:$0xff] %vm138_vm0, %v2657_v0  ;;  %154 = vst.msk [vmem:[#allocation2 + $0x78] sm:$0xff] %vm138_vm0, %v2657_v0  ;;  %v220_v17 = vld [vmem:[%s1756_s30 + $0x80] sm:$0xff]  ;;  %v221_v18 = vld [vmem:[%s1756_s30 + $0x88] sm:$0xff]  ;;  %p1568_p10 = scmp.ne.s32.totalorder %s2607_s3, %s1567_s13  ;;  %p2666_p11 = scmp.ne.s32.totalorder %s2661_s18, 0 }
  0x3e   : > { %155 = vst.msk [vmem:[#allocation2 + $0x80] sm:$0xff] %vm138_vm0, %v2657_v0  ;;  %156 = vst.msk [vmem:[#allocation2 + $0x88] sm:$0xff] %vm138_vm0, %v2657_v0  ;;  %v222_v19 = vld [vmem:[%s1756_s30 + $0x90] sm:$0xff]  ;;  %v223_v20 = vld [vmem:[%s1756_s30 + $0x98] sm:$0xff]  ;;  %s1641_s14 = smov [#allocation7]  }
  0x3f   : > { %157 = vst.msk [vmem:[#allocation2 + $0x90] sm:$0xff] %vm138_vm0, %v2657_v0  ;;  %158 = vst.msk [vmem:[#allocation2 + $0x98] sm:$0xff] %vm138_vm0, %v2657_v0  ;;  %276 = vrot.lane.b32.xlu0 %v208_v5, %s1637_s17  ;;  %278 = vrot.lane.b32.xlu1 %v209_v6, %s1637_s17  ;;  %v224_v21 = vld [vmem:[%s1756_s30 + $0xa0] sm:$0xff]  ;;  %v225_v22 = vld [vmem:[%s1756_s30 + $0xa8] sm:$0xff]  ;;  %p1569_p12 = pnand %p1568_p10, %p2666_p11  ;;  %s1571_s16 = sshll.u32 %s1641_s14, 4  ;;  %s1572_s16 = int_to_ptr.vmem [resolvable:$false] %s1571_s16 }
  0x40   : > { %159 = vst.msk [vmem:[#allocation2 + $0xa0] sm:$0xff] %vm138_vm0, %v2657_v0  ;;  %160 = vst.msk [vmem:[#allocation2 + $0xa8] sm:$0xff] %vm138_vm0, %v2657_v0  ;;  %v226_v23 = vld [vmem:[%s1756_s30 + $0xb0] sm:$0xff]  ;;  %v227_v24 = vld [vmem:[%s1756_s30 + $0xb8] sm:$0xff]  ;;  %s1573_s20 = scalar_lea.vmem %s1572_s16, 8192  ;;  %p1574_p5 = scmp.lt.s32.totalorder %s2607_s3, %s1572_s16 }
  0x41   : > { %161 = vst.msk [vmem:[#allocation2 + $0xb0] sm:$0xff] %vm138_vm0, %v2657_v0  ;;  %162 = vst.msk [vmem:[#allocation2 + $0xb8] sm:$0xff] %vm138_vm0, %v2657_v0  ;;  %v228_v25 = vld [vmem:[%s1756_s30 + $0xc0] sm:$0xff]  ;;  %v229_v26 = vld [vmem:[%s1756_s30 + $0xc8] sm:$0xff]  ;;  %p1570_p4 = pneg %p1569_p12  ;;  %p1575_p7 = scmp.lt.s32.totalorder %s1573_s20, %s1567_s13 }
  0x42   : > { %163 = vst.msk [vmem:[#allocation2 + $0xc0] sm:$0xff] %vm138_vm0, %v2657_v0  ;;  %164 = vst.msk [vmem:[#allocation2 + $0xc8] sm:$0xff] %vm138_vm0, %v2657_v0  ;;  %v230_v27 = vld [vmem:[%s1756_s30 + $0xd0] sm:$0xff]  ;;  %v231_v28 = vld [vmem:[%s1756_s30 + $0xd8] sm:$0xff] }
  0x43   : > { %165 = vst.msk [vmem:[#allocation2 + $0xd0] sm:$0xff] %vm138_vm0, %v2657_v0  ;;  %166 = vst.msk [vmem:[#allocation2 + $0xd8] sm:$0xff] %vm138_vm0, %v2657_v0  ;;  %280 = vrot.lane.b32.xlu0 %v210_v7, %s1637_s17  ;;  %282 = vrot.lane.b32.xlu1 %v211_v8, %s1637_s17  ;;  %v232_v29 = vld [vmem:[%s1756_s30 + $0xe0] sm:$0xff]  ;;  %v233_v30 = vld [vmem:[%s1756_s30 + $0xe8] sm:$0xff]  ;;  %p1576_p8 = por %p1575_p7, %p1574_p5 }
  0x44   : > { %167 = vst.msk [vmem:[#allocation2 + $0xe0] sm:$0xff] %vm138_vm0, %v2657_v0  ;;  %168 = vst.msk [vmem:[#allocation2 + $0xe8] sm:$0xff] %vm138_vm0, %v2657_v0  ;;  %v234_v31 = vld [vmem:[%s1756_s30 + $0xf0] sm:$0xff]  ;;  %v235_v32 = vld [vmem:[%s1756_s30 + $0xf8] sm:$0xff] }
  0x45   : > { %169 = vst.msk [vmem:[#allocation2 + $0xf0] sm:$0xff] %vm138_vm0, %v2657_v0  ;;  %170 = vst.msk [vmem:[#allocation2 + $0xf8] sm:$0xff] %vm138_vm0, %v2657_v0  ;;  %p1577_p9 = pnand %p1576_p8, %p1570_p4 }
  0x46   : > { %172 = vst.msk [vmem:[#allocation2] sm:$0xff] %vm171_vm1, %v2657_v0  ;;  %174 = vst.msk [vmem:[#allocation2 + $0x10] sm:$0xff] %vm171_vm1, %v2657_v0 }
  0x47   : > { %173 = vst.msk [vmem:[#allocation2 + $0x8] sm:$0xff] %vm171_vm1, %v2657_v0  ;;  %175 = vst.msk [vmem:[#allocation2 + $0x18] sm:$0xff] %vm171_vm1, %v2657_v0  ;;  %284 = vrot.lane.b32.xlu0 %v212_v9, %s1637_s17  ;;  %286 = vrot.lane.b32.xlu1 %v213_v10, %s1637_s17 }
  0x48   : > { %176 = vst.msk [vmem:[#allocation2 + $0x20] sm:$0xff] %vm171_vm1, %v2657_v0  ;;  %177 = vst.msk [vmem:[#allocation2 + $0x28] sm:$0xff] %vm171_vm1, %v2657_v0 }
  0x49   : > { %178 = vst.msk [vmem:[#allocation2 + $0x30] sm:$0xff] %vm171_vm1, %v2657_v0  ;;  %179 = vst.msk [vmem:[#allocation2 + $0x38] sm:$0xff] %vm171_vm1, %v2657_v0 }
  0x4a   : > { %180 = vst.msk [vmem:[#allocation2 + $0x40] sm:$0xff] %vm171_vm1, %v2657_v0  ;;  %181 = vst.msk [vmem:[#allocation2 + $0x48] sm:$0xff] %vm171_vm1, %v2657_v0 }
  0x4b   : > { %182 = vst.msk [vmem:[#allocation2 + $0x50] sm:$0xff] %vm171_vm1, %v2657_v0  ;;  %183 = vst.msk [vmem:[#allocation2 + $0x58] sm:$0xff] %vm171_vm1, %v2657_v0  ;;  %288 = vrot.lane.b32.xlu0 %v214_v11, %s1637_s17  ;;  %290 = vrot.lane.b32.xlu1 %v215_v12, %s1637_s17 }
  0x4c   : > { %184 = vst.msk [vmem:[#allocation2 + $0x60] sm:$0xff] %vm171_vm1, %v2657_v0  ;;  %185 = vst.msk [vmem:[#allocation2 + $0x68] sm:$0xff] %vm171_vm1, %v2657_v0 }
  0x4d   : > { %186 = vst.msk [vmem:[#allocation2 + $0x70] sm:$0xff] %vm171_vm1, %v2657_v0  ;;  %187 = vst.msk [vmem:[#allocation2 + $0x78] sm:$0xff] %vm171_vm1, %v2657_v0 }
  0x4e   : > { %188 = vst.msk [vmem:[#allocation2 + $0x80] sm:$0xff] %vm171_vm1, %v2657_v0  ;;  %189 = vst.msk [vmem:[#allocation2 + $0x88] sm:$0xff] %vm171_vm1, %v2657_v0 }
  0x4f   : > { %190 = vst.msk [vmem:[#allocation2 + $0x90] sm:$0xff] %vm171_vm1, %v2657_v0  ;;  %191 = vst.msk [vmem:[#allocation2 + $0x98] sm:$0xff] %vm171_vm1, %v2657_v0  ;;  %292 = vrot.lane.b32.xlu0 %v216_v13, %s1637_s17  ;;  %294 = vrot.lane.b32.xlu1 %v217_v14, %s1637_s17 }
  0x50   : > { %192 = vst.msk [vmem:[#allocation2 + $0xa0] sm:$0xff] %vm171_vm1, %v2657_v0  ;;  %193 = vst.msk [vmem:[#allocation2 + $0xa8] sm:$0xff] %vm171_vm1, %v2657_v0 }
  0x51   : > { %194 = vst.msk [vmem:[#allocation2 + $0xb0] sm:$0xff] %vm171_vm1, %v2657_v0  ;;  %195 = vst.msk [vmem:[#allocation2 + $0xb8] sm:$0xff] %vm171_vm1, %v2657_v0 }
  0x52   : > { %196 = vst.msk [vmem:[#allocation2 + $0xc0] sm:$0xff] %vm171_vm1, %v2657_v0  ;;  %197 = vst.msk [vmem:[#allocation2 + $0xc8] sm:$0xff] %vm171_vm1, %v2657_v0 }
  0x53   : > { %198 = vst.msk [vmem:[#allocation2 + $0xd0] sm:$0xff] %vm171_vm1, %v2657_v0  ;;  %199 = vst.msk [vmem:[#allocation2 + $0xd8] sm:$0xff] %vm171_vm1, %v2657_v0  ;;  %296 = vrot.lane.b32.xlu0 %v218_v15, %s1637_s17  ;;  %298 = vrot.lane.b32.xlu1 %v219_v16, %s1637_s17 }
  0x54   : > { %200 = vst.msk [vmem:[#allocation2 + $0xe0] sm:$0xff] %vm171_vm1, %v2657_v0  ;;  %201 = vst.msk [vmem:[#allocation2 + $0xe8] sm:$0xff] %vm171_vm1, %v2657_v0 }
  0x55   : > { %202 = vst.msk [vmem:[#allocation2 + $0xf0] sm:$0xff] %vm171_vm1, %v2657_v0  ;;  %203 = vst.msk [vmem:[#allocation2 + $0xf8] sm:$0xff] %vm171_vm1, %v2657_v0 }
  0x57   : > { %300 = vrot.lane.b32.xlu0 %v220_v17, %s1637_s17  ;;  %302 = vrot.lane.b32.xlu1 %v221_v18, %s1637_s17 }
  0x5b   : > { %304 = vrot.lane.b32.xlu0 %v222_v19, %s1637_s17  ;;  %306 = vrot.lane.b32.xlu1 %v223_v20, %s1637_s17 }
  0x5f   : > { %308 = vrot.lane.b32.xlu0 %v224_v21, %s1637_s17  ;;  %310 = vrot.lane.b32.xlu1 %v225_v22, %s1637_s17 }
  0x63   : > { %312 = vrot.lane.b32.xlu0 %v226_v23, %s1637_s17  ;;  %314 = vrot.lane.b32.xlu1 %v227_v24, %s1637_s17 }
  0x67   : > { %316 = vrot.lane.b32.xlu0 %v228_v25, %s1637_s17  ;;  %318 = vrot.lane.b32.xlu1 %v229_v26, %s1637_s17 }
  0x6b   : > { %320 = vrot.lane.b32.xlu0 %v230_v27, %s1637_s17  ;;  %322 = vrot.lane.b32.xlu1 %v231_v28, %s1637_s17 }
  0x6f   : > { %324 = vrot.lane.b32.xlu0 %v232_v29, %s1637_s17  ;;  %326 = vrot.lane.b32.xlu1 %v233_v30, %s1637_s17 }
  0x73   : > { %328 = vrot.lane.b32.xlu0 %v234_v31, %s1637_s17  ;;  %330 = vrot.lane.b32.xlu1 %v235_v32, %s1637_s17 }
  0xa9   : > { %v269_v33 = vpop.permute.xlu0 %268  ;;  %v273_v34 = vpop.permute.xlu1 %272 }
  0xaa   : > { %365 = vst.msk [vmem:[#allocation2] sm:$0xff] %vm364_vm2, %v269_v33  ;;  %367 = vst.msk [vmem:[#allocation2 + $0x10] sm:$0xff] %vm364_vm2, %v273_v34 }
  0xad   : > { %v271_v35 = vpop.permute.xlu0 %270  ;;  %v275_v36 = vpop.permute.xlu1 %274 }
  0xae   : > { %366 = vst.msk [vmem:[#allocation2 + $0x8] sm:$0xff] %vm364_vm2, %v271_v35  ;;  %368 = vst.msk [vmem:[#allocation2 + $0x18] sm:$0xff] %vm364_vm2, %v275_v36 }
  0xb1   : > { %v277_v37 = vpop.permute.xlu0 %276  ;;  %v1958_v38 = vld [vmem:[#allocation2] sm:$0xff]  ;;  %v279_v39 = vpop.permute.xlu1 %278  ;;  %v1960_v40 = vld [vmem:[#allocation2 + $0x10] sm:$0xff] }
  0xb2   : > { %369 = vst.msk [vmem:[#allocation2 + $0x20] sm:$0xff] %vm364_vm2, %v277_v37  ;;  %v1964_v41 = vmul.f32 0.375, %v1958_v38  ;;  %370 = vst.msk [vmem:[#allocation2 + $0x28] sm:$0xff] %vm364_vm2, %v279_v39  ;;  %v1970_v42 = vmul.f32 0.375, %v1960_v40 }
  0xb4   : > { %525 = vrot.lane.b32.xlu0 %v1964_v41, %s1638_s25 }
  0xb5   : > { %v281_v43 = vpop.permute.xlu0 %280  ;;  %v1972_v44 = vld [vmem:[#allocation2 + $0x8] sm:$0xff]  ;;  %v283_v45 = vpop.permute.xlu1 %282  ;;  %v1974_v46 = vld [vmem:[#allocation2 + $0x18] sm:$0xff] }
  0xb6   : > { %371 = vst.msk [vmem:[#allocation2 + $0x30] sm:$0xff] %vm364_vm2, %v281_v43  ;;  %v1978_v47 = vmul.f32 0.375, %v1972_v44  ;;  %372 = vst.msk [vmem:[#allocation2 + $0x38] sm:$0xff] %vm364_vm2, %v283_v45  ;;  %v1986_v48 = vmul.f32 0.375, %v1974_v46 }
  0xb8   : > { %527 = vrot.lane.b32.xlu1 %v1978_v47, %s1638_s25  ;;  %529 = vrot.lane.b32.xlu0 %v1970_v42, %s1638_s25 }
  0xb9   : > { %v285_v49 = vpop.permute.xlu0 %284  ;;  %v1988_v50 = vld [vmem:[#allocation2 + $0x20] sm:$0xff]  ;;  %v287_v51 = vpop.permute.xlu1 %286  ;;  %v1990_v52 = vld [vmem:[#allocation2 + $0x28] sm:$0xff] }
  0xba   : > { %373 = vst.msk [vmem:[#allocation2 + $0x40] sm:$0xff] %vm364_vm2, %v285_v49  ;;  %v1994_v53 = vmul.f32 0.375, %v1988_v50  ;;  %374 = vst.msk [vmem:[#allocation2 + $0x48] sm:$0xff] %vm364_vm2, %v287_v51  ;;  %v2002_v54 = vmul.f32 0.375, %v1990_v52 }
  0xbc   : > { %531 = vrot.lane.b32.xlu1 %v1986_v48, %s1638_s25  ;;  %533 = vrot.lane.b32.xlu0 %v1994_v53, %s1638_s25 }
  0xbd   : > { %v289_v55 = vpop.permute.xlu0 %288  ;;  %v2004_v56 = vld [vmem:[#allocation2 + $0x30] sm:$0xff]  ;;  %v291_v57 = vpop.permute.xlu1 %290  ;;  %v2006_v58 = vld [vmem:[#allocation2 + $0x38] sm:$0xff] }
  0xbe   : > { %375 = vst.msk [vmem:[#allocation2 + $0x50] sm:$0xff] %vm364_vm2, %v289_v55  ;;  %v2010_v59 = vmul.f32 0.375, %v2004_v56  ;;  %376 = vst.msk [vmem:[#allocation2 + $0x58] sm:$0xff] %vm364_vm2, %v291_v57  ;;  %v2018_v60 = vmul.f32 0.375, %v2006_v58 }
  0xc0   : > { %535 = vrot.lane.b32.xlu1 %v2002_v54, %s1638_s25  ;;  %537 = vrot.lane.b32.xlu0 %v2010_v59, %s1638_s25 }
  0xc1   : > { %v293_v61 = vpop.permute.xlu0 %292  ;;  %v2020_v62 = vld [vmem:[#allocation2 + $0x40] sm:$0xff]  ;;  %v295_v63 = vpop.permute.xlu1 %294  ;;  %v2022_v1 = vld [vmem:[#allocation2 + $0x48] sm:$0xff] }
  0xc2   : > { %377 = vst.msk [vmem:[#allocation2 + $0x60] sm:$0xff] %vm364_vm2, %v293_v61  ;;  %v2026_v2 = vmul.f32 0.375, %v2020_v62  ;;  %378 = vst.msk [vmem:[#allocation2 + $0x68] sm:$0xff] %vm364_vm2, %v295_v63  ;;  %v2034_v3 = vmul.f32 0.375, %v2022_v1 }
  0xc4   : > { %539 = vrot.lane.b32.xlu1 %v2018_v60, %s1638_s25  ;;  %541 = vrot.lane.b32.xlu0 %v2026_v2, %s1638_s25 }
  0xc5   : > { %v297_v4 = vpop.permute.xlu0 %296  ;;  %v2036_v5 = vld [vmem:[#allocation2 + $0x50] sm:$0xff]  ;;  %v299_v6 = vpop.permute.xlu1 %298  ;;  %v2038_v7 = vld [vmem:[#allocation2 + $0x58] sm:$0xff] }
  0xc6   : > { %379 = vst.msk [vmem:[#allocation2 + $0x70] sm:$0xff] %vm364_vm2, %v297_v4  ;;  %v2042_v8 = vmul.f32 0.375, %v2036_v5  ;;  %380 = vst.msk [vmem:[#allocation2 + $0x78] sm:$0xff] %vm364_vm2, %v299_v6  ;;  %v2050_v9 = vmul.f32 0.375, %v2038_v7 }
  0xc8   : > { %543 = vrot.lane.b32.xlu1 %v2034_v3, %s1638_s25  ;;  %545 = vrot.lane.b32.xlu0 %v2042_v8, %s1638_s25 }
  0xc9   : > { %v301_v10 = vpop.permute.xlu0 %300  ;;  %v2052_v11 = vld [vmem:[#allocation2 + $0x60] sm:$0xff]  ;;  %v303_v12 = vpop.permute.xlu1 %302  ;;  %v2054_v13 = vld [vmem:[#allocation2 + $0x68] sm:$0xff] }
  0xca   : > { %381 = vst.msk [vmem:[#allocation2 + $0x80] sm:$0xff] %vm364_vm2, %v301_v10  ;;  %v2058_v14 = vmul.f32 0.375, %v2052_v11  ;;  %382 = vst.msk [vmem:[#allocation2 + $0x88] sm:$0xff] %vm364_vm2, %v303_v12  ;;  %v2066_v15 = vmul.f32 0.375, %v2054_v13 }
  0xcc   : > { %547 = vrot.lane.b32.xlu1 %v2050_v9, %s1638_s25  ;;  %549 = vrot.lane.b32.xlu0 %v2058_v14, %s1638_s25 }
  0xcd   : > { %v305_v16 = vpop.permute.xlu0 %304  ;;  %v2068_v17 = vld [vmem:[#allocation2 + $0x70] sm:$0xff]  ;;  %v307_v18 = vpop.permute.xlu1 %306  ;;  %v2070_v19 = vld [vmem:[#allocation2 + $0x78] sm:$0xff] }
  0xce   : > { %383 = vst.msk [vmem:[#allocation2 + $0x90] sm:$0xff] %vm364_vm2, %v305_v16  ;;  %v2074_v20 = vmul.f32 0.375, %v2068_v17  ;;  %384 = vst.msk [vmem:[#allocation2 + $0x98] sm:$0xff] %vm364_vm2, %v307_v18  ;;  %v2082_v21 = vmul.f32 0.375, %v2070_v19 }
  0xd0   : > { %551 = vrot.lane.b32.xlu1 %v2066_v15, %s1638_s25  ;;  %553 = vrot.lane.b32.xlu0 %v2074_v20, %s1638_s25 }
  0xd1   : > { %v309_v22 = vpop.permute.xlu0 %308  ;;  %v2084_v23 = vld [vmem:[#allocation2 + $0x80] sm:$0xff]  ;;  %v311_v24 = vpop.permute.xlu1 %310  ;;  %v2086_v25 = vld [vmem:[#allocation2 + $0x88] sm:$0xff] }
  0xd2   : > { %385 = vst.msk [vmem:[#allocation2 + $0xa0] sm:$0xff] %vm364_vm2, %v309_v22  ;;  %v2090_v26 = vmul.f32 0.375, %v2084_v23  ;;  %386 = vst.msk [vmem:[#allocation2 + $0xa8] sm:$0xff] %vm364_vm2, %v311_v24  ;;  %v2098_v27 = vmul.f32 0.375, %v2086_v25 }
  0xd4   : > { %555 = vrot.lane.b32.xlu1 %v2082_v21, %s1638_s25  ;;  %557 = vrot.lane.b32.xlu0 %v2090_v26, %s1638_s25 }
  0xd5   : > { %v313_v28 = vpop.permute.xlu0 %312  ;;  %v2100_v29 = vld [vmem:[#allocation2 + $0x90] sm:$0xff]  ;;  %v315_v30 = vpop.permute.xlu1 %314  ;;  %v2102_v31 = vld [vmem:[#allocation2 + $0x98] sm:$0xff] }
  0xd6   : > { %387 = vst.msk [vmem:[#allocation2 + $0xb0] sm:$0xff] %vm364_vm2, %v313_v28  ;;  %v2106_v32 = vmul.f32 0.375, %v2100_v29  ;;  %388 = vst.msk [vmem:[#allocation2 + $0xb8] sm:$0xff] %vm364_vm2, %v315_v30  ;;  %v2114_v33 = vmul.f32 0.375, %v2102_v31 }
  0xd8   : > { %559 = vrot.lane.b32.xlu1 %v2098_v27, %s1638_s25  ;;  %561 = vrot.lane.b32.xlu0 %v2106_v32, %s1638_s25 }
  0xd9   : > { %v317_v34 = vpop.permute.xlu0 %316  ;;  %v2116_v35 = vld [vmem:[#allocation2 + $0xa0] sm:$0xff]  ;;  %v319_v36 = vpop.permute.xlu1 %318  ;;  %v2118_v37 = vld [vmem:[#allocation2 + $0xa8] sm:$0xff] }
  0xda   : > { %389 = vst.msk [vmem:[#allocation2 + $0xc0] sm:$0xff] %vm364_vm2, %v317_v34  ;;  %v2122_v39 = vmul.f32 0.375, %v2116_v35  ;;  %390 = vst.msk [vmem:[#allocation2 + $0xc8] sm:$0xff] %vm364_vm2, %v319_v36  ;;  %v2130_v43 = vmul.f32 0.375, %v2118_v37 }
  0xdc   : > { %563 = vrot.lane.b32.xlu1 %v2114_v33, %s1638_s25  ;;  %565 = vrot.lane.b32.xlu0 %v2122_v39, %s1638_s25 }
  0xdd   : > { %v321_v45 = vpop.permute.xlu0 %320  ;;  %v2132_v49 = vld [vmem:[#allocation2 + $0xb0] sm:$0xff]  ;;  %v323_v51 = vpop.permute.xlu1 %322  ;;  %v2134_v55 = vld [vmem:[#allocation2 + $0xb8] sm:$0xff] }
  0xde   : > { %391 = vst.msk [vmem:[#allocation2 + $0xd0] sm:$0xff] %vm364_vm2, %v321_v45  ;;  %v483_v57 = vmul.f32 0.375, %v2132_v49  ;;  %392 = vst.msk [vmem:[#allocation2 + $0xd8] sm:$0xff] %vm364_vm2, %v323_v51  ;;  %v484_v61 = vmul.f32 0.375, %v2134_v55 }
  0xe0   : > { %567 = vrot.lane.b32.xlu1 %v2130_v43, %s1638_s25  ;;  %569 = vrot.lane.b32.xlu0 %v483_v57, %s1638_s25 }
  0xe1   : > { %v325_v63 = vpop.permute.xlu0 %324  ;;  %v2143_v4 = vld [vmem:[#allocation2 + $0xc0] sm:$0xff]  ;;  %v327_v6 = vpop.permute.xlu1 %326  ;;  %v2145_v10 = vld [vmem:[#allocation2 + $0xc8] sm:$0xff] }
  0xe2   : > { %393 = vst.msk [vmem:[#allocation2 + $0xe0] sm:$0xff] %vm364_vm2, %v325_v63  ;;  %v485_v12 = vmul.f32 0.375, %v2143_v4  ;;  %394 = vst.msk [vmem:[#allocation2 + $0xe8] sm:$0xff] %vm364_vm2, %v327_v6  ;;  %v486_v16 = vmul.f32 0.375, %v2145_v10 }
  0xe4   : > { %571 = vrot.lane.b32.xlu1 %v484_v61, %s1638_s25  ;;  %573 = vrot.lane.b32.xlu0 %v485_v12, %s1638_s25 }
  0xe5   : > { %v329_v18 = vpop.permute.xlu0 %328  ;;  %v2153_v22 = vld [vmem:[#allocation2 + $0xd0] sm:$0xff]  ;;  %v331_v24 = vpop.permute.xlu1 %330  ;;  %v2155_v28 = vld [vmem:[#allocation2 + $0xd8] sm:$0xff] }
  0xe6   : > { %395 = vst.msk [vmem:[#allocation2 + $0xf0] sm:$0xff] %vm364_vm2, %v329_v18  ;;  %v487_v30 = vmul.f32 0.375, %v2153_v22  ;;  %396 = vst.msk [vmem:[#allocation2 + $0xf8] sm:$0xff] %vm364_vm2, %v331_v24  ;;  %v488_v34 = vmul.f32 0.375, %v2155_v28 }
  0xe8   : > { %575 = vrot.lane.b32.xlu1 %v486_v16, %s1638_s25  ;;  %577 = vrot.lane.b32.xlu0 %v487_v30, %s1638_s25 }
  0xe9   : > { %v2163_v36 = vld [vmem:[#allocation2 + $0xe0] sm:$0xff]  ;;  %v2165_v45 = vld [vmem:[#allocation2 + $0xe8] sm:$0xff] }
  0xea   : > { %v489_v51 = vmul.f32 0.375, %v2163_v36  ;;  %v490_v63 = vmul.f32 0.375, %v2165_v45 }
  0xec   : > { %579 = vrot.lane.b32.xlu1 %v488_v34, %s1638_s25  ;;  %581 = vrot.lane.b32.xlu0 %v489_v51, %s1638_s25 }
  0xed   : > { %v2171_v6 = vld [vmem:[#allocation2 + $0xf0] sm:$0xff]  ;;  %v2173_v18 = vld [vmem:[#allocation2 + $0xf8] sm:$0xff] }
  0xee   : > { %v491_v24 = vmul.f32 0.375, %v2171_v6  ;;  %v2179_v0 = vmul.f32 0.375, %v2173_v18 }
  0xf0   : > { %583 = vrot.lane.b32.xlu1 %v490_v63, %s1638_s25  ;;  %585 = vrot.lane.b32.xlu0 %v491_v24, %s1638_s25 }
  0xf4   : > { %587 = vrot.lane.b32.xlu1 %v2179_v0, %s1638_s25  ;;  %653 = vrot.lane.b32.xlu0 %v1964_v41, %s1639_s27  ;;  %v429_v41 = vmul.f32 0.125, %v1958_v38  ;;  %v430_v38 = vmul.f32 0.125, %v1972_v44 }
  0xf8   : > { %655 = vrot.lane.b32.xlu1 %v1978_v47, %s1639_s27  ;;  %657 = vrot.lane.b32.xlu0 %v1970_v42, %s1639_s27 }
  0xfc   : > { %659 = vrot.lane.b32.xlu1 %v1986_v48, %s1639_s27  ;;  %661 = vrot.lane.b32.xlu0 %v1994_v53, %s1639_s27  ;;  %v2665_v48 = vmov 0.0   ;;  %v431_v53 = vmul.f32 0.125, %v1960_v40  ;;  %v434_v40 = vmul.f32 0.125, %v1990_v52  ;;  %v436_v52 = vmul.f32 0.125, %v2006_v58 }
  0xfd   : > { %942 = vst.msk [vmem:[#allocation3] sm:$0x3] %vm941_vm3, %v2665_v48  ;;  %943 = vst.msk [vmem:[#allocation3 + $0x28] sm:$0x3] %vm941_vm3, %v2665_v48 }
  0xfe   : > { %944 = vst.msk [vmem:[#allocation3 + $0x50] sm:$0x3] %vm941_vm3, %v2665_v48  ;;  %945 = vst.msk [vmem:[#allocation3 + $0x78] sm:$0x3] %vm941_vm3, %v2665_v48 }
  0xff   : > { %946 = vst.msk [vmem:[#allocation3 + $0xa0] sm:$0x3] %vm941_vm3, %v2665_v48  ;;  %947 = vst.msk [vmem:[#allocation3 + $0xc8] sm:$0x3] %vm941_vm3, %v2665_v48 }
 0x100   : > { %663 = vrot.lane.b32.xlu1 %v2002_v54, %s1639_s27  ;;  %665 = vrot.lane.b32.xlu0 %v2010_v59, %s1639_s27  ;;  %948 = vst.msk [vmem:[#allocation3 + $0xf0] sm:$0x3] %vm941_vm3, %v2665_v48  ;;  %949 = vst.msk [vmem:[#allocation3 + $0x118] sm:$0x3] %vm941_vm3, %v2665_v48 }
 0x101   : > { %951 = vst.msk [vmem:[#allocation3 + $0x22] sm:$0x1] %vm950_vm4, %v2665_v48  ;;  %952 = vst.msk [vmem:[#allocation3 + $0x4a] sm:$0x1] %vm950_vm4, %v2665_v48 }
 0x102   : > { %953 = vst.msk [vmem:[#allocation3 + $0x72] sm:$0x1] %vm950_vm4, %v2665_v48  ;;  %954 = vst.msk [vmem:[#allocation3 + $0x9a] sm:$0x1] %vm950_vm4, %v2665_v48 }
 0x103   : > { %955 = vst.msk [vmem:[#allocation3 + $0xc2] sm:$0x1] %vm950_vm4, %v2665_v48  ;;  %956 = vst.msk [vmem:[#allocation3 + $0xea] sm:$0x1] %vm950_vm4, %v2665_v48 }
 0x104   : > { %667 = vrot.lane.b32.xlu1 %v2018_v60, %s1639_s27  ;;  %669 = vrot.lane.b32.xlu0 %v2026_v2, %s1639_s27  ;;  %957 = vst.msk [vmem:[#allocation3 + $0x112] sm:$0x1] %vm950_vm4, %v2665_v48  ;;  %958 = vst.msk [vmem:[#allocation3 + $0x13a] sm:$0x1] %vm950_vm4, %v2665_v48  ;;  %v445_v48 = vmul.f32 0.125, %v2084_v23  ;;  %v448_v23 = vmul.f32 0.125, %v2102_v31 }
 0x108   : > { %671 = vrot.lane.b32.xlu1 %v2034_v3, %s1639_s27  ;;  %673 = vrot.lane.b32.xlu0 %v2042_v8, %s1639_s27  ;;  %v432_v3 = vmul.f32 0.125, %v1974_v46  ;;  %v433_v8 = vmul.f32 0.125, %v1988_v50 }
 0x10c   : > { %675 = vrot.lane.b32.xlu1 %v2050_v9, %s1639_s27  ;;  %677 = vrot.lane.b32.xlu0 %v2058_v14, %s1639_s27 }
 0x110   : > { %679 = vrot.lane.b32.xlu1 %v2066_v15, %s1639_s27  ;;  %681 = vrot.lane.b32.xlu0 %v2074_v20, %s1639_s27  ;;  %v435_v20 = vmul.f32 0.125, %v2004_v56  ;;  %v437_v56 = vmul.f32 0.125, %v2020_v62  ;;  %v440_v62 = vmul.f32 0.125, %v2038_v7 }
 0x114   : > { %683 = vrot.lane.b32.xlu1 %v2082_v21, %s1639_s27  ;;  %685 = vrot.lane.b32.xlu0 %v2090_v26, %s1639_s27 }
 0x118   : > { %687 = vrot.lane.b32.xlu1 %v2098_v27, %s1639_s27  ;;  %689 = vrot.lane.b32.xlu0 %v2106_v32, %s1639_s27 }
 0x11c   : > { %691 = vrot.lane.b32.xlu1 %v2114_v33, %s1639_s27  ;;  %693 = vrot.lane.b32.xlu0 %v2122_v39, %s1639_s27 }
 0x120   : > { %695 = vrot.lane.b32.xlu1 %v2130_v43, %s1639_s27  ;;  %697 = vrot.lane.b32.xlu0 %v483_v57, %s1639_s27  ;;  %v438_v43 = vmul.f32 0.125, %v2022_v1 }
 0x124   : > { %699 = vrot.lane.b32.xlu1 %v484_v61, %s1639_s27  ;;  %701 = vrot.lane.b32.xlu0 %v485_v12, %s1639_s27 }
 0x126   : > { %v526_v42 = vpop.permute.xlu0 %525 }
 0x127   : > { %v2231_v47 = vadd.f32 %v526_v42, %v429_v41 }
 0x128   : > { %703 = vrot.lane.b32.xlu1 %v486_v16, %s1639_s27  ;;  %705 = vrot.lane.b32.xlu0 %v487_v30, %s1639_s27  ;;  %v441_v16 = vmul.f32 0.125, %v2052_v11  ;;  %v444_v11 = vmul.f32 0.125, %v2070_v19 }
 0x12a   : > { %v528_v54 = vpop.permute.xlu1 %527  ;;  %v530_v59 = vpop.permute.xlu0 %529 }
 0x12b   : > { %v2245_v60 = vadd.f32 %v528_v54, %v430_v38  ;;  %v2247_v2 = vadd.f32 %v530_v59, %v431_v53  ;;  %v447_v59 = vmul.f32 0.125, %v2100_v29  ;;  %v450_v29 = vmul.f32 0.125, %v2118_v37 }
 0x12c   : > { %707 = vrot.lane.b32.xlu1 %v488_v34, %s1639_s27  ;;  %709 = vrot.lane.b32.xlu0 %v489_v51, %s1639_s27 }
 0x12e   : > { %v532_v9 = vpop.permute.xlu1 %531  ;;  %v534_v14 = vpop.permute.xlu0 %533 }
 0x12f   : > { %v2253_v15 = vadd.f32 %v532_v9, %v432_v3  ;;  %v2255_v44 = vadd.f32 %v534_v14, %v433_v8  ;;  %v449_v14 = vmul.f32 0.125, %v2116_v35  ;;  %v452_v35 = vmul.f32 0.125, %v2134_v55 }
 0x130   : > { %711 = vrot.lane.b32.xlu1 %v490_v63, %s1639_s27  ;;  %713 = vrot.lane.b32.xlu0 %v491_v24, %s1639_s27  ;;  %v443_v63 = vmul.f32 0.125, %v2068_v17  ;;  %v446_v17 = vmul.f32 0.125, %v2086_v25 }
 0x132   : > { %v536_v21 = vpop.permute.xlu1 %535  ;;  %v538_v26 = vpop.permute.xlu0 %537 }
 0x133   : > { %v2261_v46 = vadd.f32 %v536_v21, %v434_v40  ;;  %v2263_v50 = vadd.f32 %v538_v26, %v435_v20  ;;  %v451_v26 = vmul.f32 0.125, %v2132_v49  ;;  %v454_v49 = vmul.f32 0.125, %v2145_v10 }
 0x134   : > { %715 = vrot.lane.b32.xlu1 %v2179_v0, %s1639_s27  ;;  %813 = vrot.lane.b32.xlu0 %v429_v41, %s1640_s28  ;;  %v439_v0 = vmul.f32 0.125, %v2036_v5  ;;  %v442_v5 = vmul.f32 0.125, %v2054_v13 }
 0x136   : > { %v540_v27 = vpop.permute.xlu1 %539  ;;  %v542_v32 = vpop.permute.xlu0 %541 }
 0x137   : > { %v2278_v33 = vadd.f32 %v540_v27, %v436_v52  ;;  %v2280_v39 = vadd.f32 %v542_v32, %v437_v56  ;;  %v453_v32 = vmul.f32 0.125, %v2143_v4  ;;  %v456_v4 = vmul.f32 0.125, %v2155_v28 }
 0x138   : > { %815 = vrot.lane.b32.xlu1 %v430_v38, %s1640_s28  ;;  %817 = vrot.lane.b32.xlu0 %v431_v53, %s1640_s28 }
 0x13a   : > { %v544_v57 = vpop.permute.xlu1 %543  ;;  %v546_v61 = vpop.permute.xlu0 %545 }
 0x13b   : > { %v2286_v12 = vadd.f32 %v544_v57, %v438_v43  ;;  %v2288_v58 = vadd.f32 %v546_v61, %v439_v0  ;;  %v455_v61 = vmul.f32 0.125, %v2153_v22  ;;  %v458_v22 = vmul.f32 0.125, %v2165_v45 }
 0x13c   : > { %819 = vrot.lane.b32.xlu1 %v432_v3, %s1640_s28  ;;  %821 = vrot.lane.b32.xlu0 %v433_v8, %s1640_s28 }
 0x13e   : > { %v548_v30 = vpop.permute.xlu1 %547  ;;  %v550_v34 = vpop.permute.xlu0 %549 }
 0x13f   : > { %v2294_v51 = vadd.f32 %v548_v30, %v440_v62  ;;  %v2296_v1 = vadd.f32 %v550_v34, %v441_v16  ;;  %v457_v34 = vmul.f32 0.125, %v2163_v36  ;;  %v460_v36 = vmul.f32 0.125, %v2173_v18 }
 0x140   : > { %823 = vrot.lane.b32.xlu1 %v434_v40, %s1640_s28  ;;  %825 = vrot.lane.b32.xlu0 %v435_v20, %s1640_s28 }
 0x142   : > { %v552_v24 = vpop.permute.xlu1 %551  ;;  %v554_v41 = vpop.permute.xlu0 %553 }
 0x143   : > { %v2302_v42 = vadd.f32 %v552_v24, %v442_v5  ;;  %v2304_v7 = vadd.f32 %v554_v41, %v443_v63  ;;  %v459_v41 = vmul.f32 0.125, %v2171_v6 }
 0x144   : > { %827 = vrot.lane.b32.xlu1 %v436_v52, %s1640_s28  ;;  %829 = vrot.lane.b32.xlu0 %v437_v56, %s1640_s28 }
 0x146   : > { %v556_v38 = vpop.permute.xlu1 %555  ;;  %v558_v53 = vpop.permute.xlu0 %557 }
 0x147   : > { %v2310_v54 = vadd.f32 %v556_v38, %v444_v11  ;;  %v2312_v13 = vadd.f32 %v558_v53, %v445_v48 }
 0x148   : > { %831 = vrot.lane.b32.xlu1 %v438_v43, %s1640_s28  ;;  %833 = vrot.lane.b32.xlu0 %v439_v0, %s1640_s28 }
 0x14a   : > { %v560_v3 = vpop.permute.xlu1 %559  ;;  %v562_v8 = vpop.permute.xlu0 %561 }
 0x14b   : > { %v2318_v9 = vadd.f32 %v560_v3, %v446_v17  ;;  %v2320_v19 = vadd.f32 %v562_v8, %v447_v59 }
 0x14c   : > { %835 = vrot.lane.b32.xlu1 %v440_v62, %s1640_s28  ;;  %837 = vrot.lane.b32.xlu0 %v441_v16, %s1640_s28 }
 0x14e   : > { %v564_v40 = vpop.permute.xlu1 %563  ;;  %v566_v20 = vpop.permute.xlu0 %565 }
 0x14f   : > { %v2326_v21 = vadd.f32 %v564_v40, %v448_v23  ;;  %v2328_v25 = vadd.f32 %v566_v20, %v449_v14 }
 0x150   : > { %839 = vrot.lane.b32.xlu1 %v442_v5, %s1640_s28  ;;  %841 = vrot.lane.b32.xlu0 %v443_v63, %s1640_s28 }
 0x152   : > { %v568_v52 = vpop.permute.xlu1 %567  ;;  %v570_v56 = vpop.permute.xlu0 %569 }
 0x153   : > { %v2334_v27 = vadd.f32 %v568_v52, %v450_v29  ;;  %v2336_v31 = vadd.f32 %v570_v56, %v451_v26 }
 0x154   : > { %843 = vrot.lane.b32.xlu1 %v444_v11, %s1640_s28  ;;  %845 = vrot.lane.b32.xlu0 %v445_v48, %s1640_s28 }
 0x156   : > { %v572_v43 = vpop.permute.xlu1 %571  ;;  %v574_v0 = vpop.permute.xlu0 %573 }
 0x157   : > { %v2342_v57 = vadd.f32 %v572_v43, %v452_v35  ;;  %v2344_v37 = vadd.f32 %v574_v0, %v453_v32 }
 0x158   : > { %847 = vrot.lane.b32.xlu1 %v446_v17, %s1640_s28  ;;  %849 = vrot.lane.b32.xlu0 %v447_v59, %s1640_s28 }
 0x15a   : > { %v576_v62 = vpop.permute.xlu1 %575  ;;  %v578_v16 = vpop.permute.xlu0 %577 }
 0x15b   : > { %v2350_v30 = vadd.f32 %v576_v62, %v454_v49  ;;  %v2352_v55 = vadd.f32 %v578_v16, %v455_v61 }
 0x15c   : > { %851 = vrot.lane.b32.xlu1 %v448_v23, %s1640_s28  ;;  %853 = vrot.lane.b32.xlu0 %v449_v14, %s1640_s28 }
 0x15e   : > { %v580_v5 = vpop.permute.xlu1 %579  ;;  %v582_v63 = vpop.permute.xlu0 %581 }
 0x15f   : > { %v2358_v24 = vadd.f32 %v580_v5, %v456_v4  ;;  %v2360_v10 = vadd.f32 %v582_v63, %v457_v34 }
 0x160   : > { %855 = vrot.lane.b32.xlu1 %v450_v29, %s1640_s28  ;;  %857 = vrot.lane.b32.xlu0 %v451_v26, %s1640_s28 }
 0x162   : > { %v584_v11 = vpop.permute.xlu1 %583  ;;  %v586_v48 = vpop.permute.xlu0 %585 }
 0x163   : > { %v2366_v38 = vadd.f32 %v584_v11, %v458_v22  ;;  %v2368_v28 = vadd.f32 %v586_v48, %v459_v41 }
 0x164   : > { %859 = vrot.lane.b32.xlu1 %v452_v35, %s1640_s28  ;;  %861 = vrot.lane.b32.xlu0 %v453_v32, %s1640_s28 }
 0x166   : > { %v588_v53 = vpop.permute.xlu1 %587  ;;  %v654_v17 = vpop.permute.xlu0 %653 }
 0x167   : > { %v2373_v59 = vadd.f32 %v588_v53, %v460_v36 }
 0x168   : > { %863 = vrot.lane.b32.xlu1 %v454_v49, %s1640_s28  ;;  %865 = vrot.lane.b32.xlu0 %v455_v61, %s1640_s28 }
 0x16a   : > { %v656_v45 = vpop.permute.xlu1 %655  ;;  %v658_v6 = vpop.permute.xlu0 %657 }
 0x16c   : > { %867 = vrot.lane.b32.xlu1 %v456_v4, %s1640_s28  ;;  %869 = vrot.lane.b32.xlu0 %v457_v34, %s1640_s28 }
 0x16e   : > { %v660_v3 = vpop.permute.xlu1 %659  ;;  %v662_v8 = vpop.permute.xlu0 %661 }
 0x170   : > { %871 = vrot.lane.b32.xlu1 %v458_v22, %s1640_s28  ;;  %873 = vrot.lane.b32.xlu0 %v459_v41, %s1640_s28 }
 0x172   : > { %v664_v18 = vpop.permute.xlu1 %663  ;;  %v666_v23 = vpop.permute.xlu0 %665 }
 0x174   : > { %875 = vrot.lane.b32.xlu1 %v460_v36, %s1640_s28 }
 0x176   : > { %v2382_v14 = vpop.permute.xlu1 %667  ;;  %v2384_v40 = vpop.permute.xlu0 %669 }
 0x17a   : > { %v2386_v20 = vpop.permute.xlu1 %671  ;;  %v2388_v29 = vpop.permute.xlu0 %673 }
 0x17e   : > { %v2390_v26 = vpop.permute.xlu1 %675  ;;  %v2392_v52 = vpop.permute.xlu0 %677 }
 0x182   : > { %v2394_v56 = vpop.permute.xlu1 %679  ;;  %v2396_v35 = vpop.permute.xlu0 %681 }
 0x186   : > { %v684_v32 = vpop.permute.xlu1 %683  ;;  %v686_v43 = vpop.permute.xlu0 %685 }
 0x187   : > { %v2399_v0 = vadd.f32 %v684_v32, %v2310_v54  ;;  %v2402_v49 = vadd.f32 %v686_v43, %v2312_v13 }
 0x18a   : > { %v688_v61 = vpop.permute.xlu1 %687  ;;  %v690_v62 = vpop.permute.xlu0 %689 }
 0x18b   : > { %v2405_v16 = vadd.f32 %v688_v61, %v2318_v9  ;;  %v2408_v4 = vadd.f32 %v690_v62, %v2320_v19 }
 0x18e   : > { %v692_v34 = vpop.permute.xlu1 %691  ;;  %v694_v5 = vpop.permute.xlu0 %693 }
 0x18f   : > { %v2411_v63 = vadd.f32 %v692_v34, %v2326_v21  ;;  %v2414_v22 = vadd.f32 %v694_v5, %v2328_v25 }
 0x192   : > { %v696_v54 = vpop.permute.xlu1 %695  ;;  %v698_v41 = vpop.permute.xlu0 %697 }
 0x193   : > { %v2417_v13 = vadd.f32 %v696_v54, %v2334_v27  ;;  %v2420_v11 = vadd.f32 %v698_v41, %v2336_v31 }
 0x196   : > { %v700_v9 = vpop.permute.xlu1 %699  ;;  %v702_v48 = vpop.permute.xlu0 %701 }
 0x197   : > { %v2423_v19 = vadd.f32 %v700_v9, %v2342_v57  ;;  %v2426_v36 = vadd.f32 %v702_v48, %v2344_v37  ;;  %v749_v57 = vadd.f32 %v654_v17, %v2231_v47  ;;  %v752_v48 = vadd.f32 %v660_v3, %v2253_v15 }
 0x19a   : > { %v704_v21 = vpop.permute.xlu1 %703  ;;  %v706_v53 = vpop.permute.xlu0 %705 }
 0x19b   : > { %v2429_v25 = vadd.f32 %v704_v21, %v2350_v30  ;;  %v2432_v32 = vadd.f32 %v706_v53, %v2352_v55  ;;  %v750_v30 = vadd.f32 %v656_v45, %v2245_v60  ;;  %v751_v55 = vadd.f32 %v658_v6, %v2247_v2 }
 0x19c   : > { %v753_v21 = vadd.f32 %v662_v8, %v2255_v44 }
 0x19e   : > { %v2434_v27 = vpop.permute.xlu1 %707  ;;  %v2436_v31 = vpop.permute.xlu0 %709 }
 0x1a2   : > { %v2438_v43 = vpop.permute.xlu1 %711  ;;  %v2440_v61 = vpop.permute.xlu0 %713 }
 0x1a6   : > { %v2443_v37 = vpop.permute.xlu1 %715  ;;  %v814_v62 = vpop.permute.xlu0 %813 }
 0x1a7   : > { %v909_v34 = vadd.f32 %v814_v62, %v749_v57  ;;  %v754_v57 = vadd.f32 %v664_v18, %v2261_v46  ;;  %v755_v62 = vadd.f32 %v666_v23, %v2263_v50  ;;  %v757_v46 = vadd.f32 %v2384_v40, %v2280_v39 }
 0x1a8   : > { %v758_v50 = vadd.f32 %v2386_v20, %v2286_v12  ;;  %v759_v18 = vadd.f32 %v2388_v29, %v2288_v58  ;;  %v2472_v39 = vadd.f32 %v2392_v52, %v2296_v1 }
 0x1a9   : > { %960 = vst.msk [vmem:[#allocation3 + $0x2] sm:$0xff] %vm959_vm5, %v909_v34 }
 0x1aa   : > { %v816_v5 = vpop.permute.xlu1 %815  ;;  %v818_v54 = vpop.permute.xlu0 %817 }
 0x1ab   : > { %v910_v41 = vadd.f32 %v816_v5, %v750_v30  ;;  %v911_v9 = vadd.f32 %v818_v54, %v751_v55  ;;  %v756_v54 = vadd.f32 %v2382_v14, %v2278_v33 }
 0x1ad   : > { %961 = vst.msk [vmem:[#allocation3 + $0xa] sm:$0xff] %vm959_vm5, %v910_v41  ;;  %962 = vst.msk [vmem:[#allocation3 + $0x12] sm:$0xff] %vm959_vm5, %v911_v9 }
 0x1ae   : > { %v820_v47 = vpop.permute.xlu1 %819  ;;  %v822_v17 = vpop.permute.xlu0 %821 }
 0x1af   : > { %v912_v53 = vadd.f32 %v820_v47, %v752_v48  ;;  %v913_v60 = vadd.f32 %v822_v17, %v753_v21  ;;  %v2466_v48 = vadd.f32 %v2390_v26, %v2294_v51 }
 0x1b0   : > { %v992_v45 = vld [vmem:[#allocation3] sm:$0xff] }
 0x1b1   : > { %v1056_v2 = vld [vmem:[#allocation3 + $0x1] sm:$0xff]  ;;  %v1024_v34 = vmul.f32 0.125, %v992_v45  ;;  %963 = vst.msk [vmem:[#allocation3 + $0x1a] sm:$0xff] %vm959_vm5, %v912_v53  ;;  %964 = vst.msk [vmem:[#allocation3 + $0x2a] sm:$0xff] %vm959_vm5, %v913_v60  ;;  %v2476_v60 = vadd.f32 %v2394_v56, %v2302_v42 }
 0x1b2   : > { %v1152_v6 = vld [vmem:[#allocation3 + $0x2] sm:$0xff]  ;;  %v1088_v30 = vmul.f32 0.375, %v1056_v2  ;;  %v824_v15 = vpop.permute.xlu1 %823  ;;  %v826_v44 = vpop.permute.xlu0 %825 }
 0x1b3   : > { %v1184_v8 = vmul.f32 0.375, %v1152_v6  ;;  %v914_v55 = vadd.f32 %v824_v15, %v754_v57  ;;  %v915_v5 = vadd.f32 %v826_v44, %v755_v62 }
 0x1b4   : > { %v1120_v3 = vadd.f32 %v1088_v30, %v1024_v34  ;;  %v993_v23 = vld [vmem:[#allocation3 + $0x8] sm:$0xff]  ;;  %v994_v14 = vld [vmem:[#allocation3 + $0x10] sm:$0xff] }
 0x1b5   : > { %v1057_v41 = vld [vmem:[#allocation3 + $0x9] sm:$0xff]  ;;  %v1025_v47 = vmul.f32 0.125, %v993_v23  ;;  %v1058_v53 = vld [vmem:[#allocation3 + $0x11] sm:$0xff]  ;;  %965 = vst.msk [vmem:[#allocation3 + $0x32] sm:$0xff] %vm959_vm5, %v914_v55  ;;  %966 = vst.msk [vmem:[#allocation3 + $0x3a] sm:$0xff] %vm959_vm5, %v915_v5  ;;  %v1026_v58 = vmul.f32 0.125, %v994_v14 }
 0x1b6   : > { %v1153_v9 = vld [vmem:[#allocation3 + $0xa] sm:$0xff]  ;;  %v1216_v21 = vadd.f32 %v1184_v8, %v1120_v3  ;;  %v1089_v17 = vmul.f32 0.375, %v1057_v41  ;;  %v1090_v40 = vmul.f32 0.375, %v1058_v53  ;;  %v1154_v20 = vld [vmem:[#allocation3 + $0x12] sm:$0xff]  ;;  %v828_v29 = vpop.permute.xlu1 %827  ;;  %v830_v26 = vpop.permute.xlu0 %829 }
 0x1b7   : > { %v1248_v33 = vld [vmem:[#allocation3 + $0x3] sm:$0xff]  ;;  %v1249_v51 = vld [vmem:[#allocation3 + $0xb] sm:$0xff]  ;;  %v1185_v2 = vmul.f32 0.375, %v1153_v9  ;;  %v916_v6 = vadd.f32 %v828_v29, %v756_v54  ;;  %v1186_v34 = vmul.f32 0.375, %v1154_v20  ;;  %v917_v15 = vadd.f32 %v830_v26, %v757_v46 }
 0x1b8   : > { %v1280_v12 = vmul.f32 0.125, %v1248_v33  ;;  %v1121_v45 = vadd.f32 %v1089_v17, %v1025_v47  ;;  %v1122_v62 = vadd.f32 %v1090_v40, %v1026_v58  ;;  %v995_v1 = vld [vmem:[#allocation3 + $0x18] sm:$0xff]  ;;  %v1281_v3 = vmul.f32 0.125, %v1249_v51  ;;  %v996_v41 = vld [vmem:[#allocation3 + $0x28] sm:$0xff] }
 0x1b9   : > { %v1059_v52 = vld [vmem:[#allocation3 + $0x19] sm:$0xff]  ;;  %v1027_v8 = vmul.f32 0.125, %v995_v1  ;;  %967 = vst.msk [vmem:[#allocation3 + $0x42] sm:$0xff] %vm959_vm5, %v916_v6  ;;  %v1028_v9 = vmul.f32 0.125, %v996_v41  ;;  %v1060_v46 = vld [vmem:[#allocation3 + $0x29] sm:$0xff]  ;;  %968 = vst.msk [vmem:[#allocation3 + $0x52] sm:$0xff] %vm959_vm5, %v917_v15 }
 0x1ba   : > { %v1312_v57 = vadd.f32 %v1280_v12, %v1216_v21  ;;  %v1155_v30 = vld [vmem:[#allocation3 + $0x1a] sm:$0xff]  ;;  %v1217_v44 = vadd.f32 %v1185_v2, %v1121_v45  ;;  %v1091_v55 = vmul.f32 0.375, %v1059_v52  ;;  %v1218_v42 = vadd.f32 %v1186_v34, %v1122_v62  ;;  %v1156_v21 = vld [vmem:[#allocation3 + $0x2a] sm:$0xff]  ;;  %v832_v47 = vpop.permute.xlu1 %831  ;;  %v834_v17 = vpop.permute.xlu0 %833 }
 0x1bb   : > { %v1250_v5 = vld [vmem:[#allocation3 + $0x13] sm:$0xff]  ;;  %v1251_v23 = vld [vmem:[#allocation3 + $0x1b] sm:$0xff]  ;;  %v1187_v56 = vmul.f32 0.375, %v1155_v30  ;;  %v1092_v12 = vmul.f32 0.375, %v1060_v46  ;;  %v1188_v40 = vmul.f32 0.375, %v1156_v21  ;;  %v918_v26 = vadd.f32 %v832_v47, %v758_v50 }
 0x1bc   : > { %1344 = vst.msk [vmem:[%s2481_s29] sm:$0xff] %vm959_vm5, %v1312_v57  ;;  %v1282_v54 = vmul.f32 0.125, %v1250_v5  ;;  %v1313_v33 = vadd.f32 %v1281_v3, %v1217_v44  ;;  %v1123_v14 = vadd.f32 %v1091_v55, %v1027_v8  ;;  %v1283_v53 = vmul.f32 0.125, %v1251_v23  ;;  %v997_v20 = vld [vmem:[#allocation3 + $0x30] sm:$0xff]  ;;  %v998_v1 = vld [vmem:[#allocation3 + $0x38] sm:$0xff] }
 0x1bd   : > { %v1061_v51 = vld [vmem:[#allocation3 + $0x31] sm:$0xff]  ;;  %v919_v45 = vadd.f32 %v834_v17, %v759_v18  ;;  %v1124_v6 = vadd.f32 %v1092_v12, %v1028_v9  ;;  %v1029_v57 = vmul.f32 0.125, %v997_v20  ;;  %v1062_v52 = vld [vmem:[#allocation3 + $0x39] sm:$0xff]  ;;  %v1030_v44 = vmul.f32 0.125, %v998_v1  ;;  %969 = vst.msk [vmem:[#allocation3 + $0x5a] sm:$0xff] %vm959_vm5, %v918_v26 }
 0x1be   : > { %v1314_v58 = vadd.f32 %v1282_v54, %v1218_v42  ;;  %v1157_v29 = vld [vmem:[#allocation3 + $0x32] sm:$0xff]  ;;  %1345 = vst.msk [vmem:[%s2481_s29 + $0x8] sm:$0xff] %vm959_vm5, %v1313_v33  ;;  %v1219_v2 = vadd.f32 %v1187_v56, %v1123_v14  ;;  %v1093_v62 = vmul.f32 0.375, %v1061_v51  ;;  %v1094_v3 = vmul.f32 0.375, %v1062_v52  ;;  %v1158_v8 = vld [vmem:[#allocation3 + $0x3a] sm:$0xff]  ;;  %v836_v50 = vpop.permute.xlu1 %835  ;;  %v838_v18 = vpop.permute.xlu0 %837 }
 0x1bf   : > { %v1252_v34 = vld [vmem:[#allocation3 + $0x2b] sm:$0xff]  ;;  %v1189_v30 = vmul.f32 0.375, %v1157_v29  ;;  %v1253_v55 = vld [vmem:[#allocation3 + $0x33] sm:$0xff]  ;;  %970 = vst.msk [vmem:[#allocation3 + $0x62] sm:$0xff] %vm959_vm5, %v919_v45  ;;  %v1220_v23 = vadd.f32 %v1188_v40, %v1124_v6  ;;  %v1190_v42 = vmul.f32 0.375, %v1158_v8  ;;  %v920_v47 = vadd.f32 %v836_v50, %v2466_v48 }
 0x1c0   : > { %1346 = vst.msk [vmem:[%s2481_s29 + $0x10] sm:$0xff] %vm959_vm5, %v1314_v58  ;;  %v1284_v15 = vmul.f32 0.125, %v1252_v34  ;;  %v1315_v5 = vadd.f32 %v1283_v53, %v1219_v2  ;;  %v1125_v41 = vadd.f32 %v1093_v62, %v1029_v57  ;;  %v1126_v56 = vadd.f32 %v1094_v3, %v1030_v44  ;;  %v999_v9 = vld [vmem:[#allocation3 + $0x40] sm:$0xff]  ;;  %v1000_v40 = vld [vmem:[#allocation3 + $0x50] sm:$0xff] }
 0x1c1   : > { %v1285_v54 = vmul.f32 0.125, %v1253_v55  ;;  %v1063_v46 = vld [vmem:[#allocation3 + $0x41] sm:$0xff]  ;;  %v921_v17 = vadd.f32 %v838_v18, %v2472_v39  ;;  %v1031_v12 = vmul.f32 0.125, %v999_v9  ;;  %v763_v20 = vadd.f32 %v2396_v35, %v2304_v7  ;;  %v1064_v48 = vld [vmem:[#allocation3 + $0x51] sm:$0xff]  ;;  %971 = vst.msk [vmem:[#allocation3 + $0x6a] sm:$0xff] %vm959_vm5, %v920_v47 }
 0x1c2   : > { %v1159_v21 = vld [vmem:[#allocation3 + $0x42] sm:$0xff]  ;;  %1347 = vst.msk [vmem:[%s2481_s29 + $0x18] sm:$0xff] %vm959_vm5, %v1315_v5  ;;  %v1221_v33 = vadd.f32 %v1189_v30, %v1125_v41  ;;  %v1316_v14 = vadd.f32 %v1284_v15, %v1220_v23  ;;  %v1095_v58 = vmul.f32 0.375, %v1063_v46  ;;  %v1222_v51 = vadd.f32 %v1190_v42, %v1126_v56  ;;  %v1160_v2 = vld [vmem:[#allocation3 + $0x52] sm:$0xff]  ;;  %v840_v39 = vpop.permute.xlu1 %839  ;;  %v842_v6 = vpop.permute.xlu0 %841 }
 0x1c3   : > { %v1254_v53 = vld [vmem:[#allocation3 + $0x3b] sm:$0xff]  ;;  %v1191_v29 = vmul.f32 0.375, %v1159_v21  ;;  %v1255_v26 = vld [vmem:[#allocation3 + $0x43] sm:$0xff]  ;;  %972 = vst.msk [vmem:[#allocation3 + $0x7a] sm:$0xff] %vm959_vm5, %v921_v17  ;;  %v1032_v34 = vmul.f32 0.125, %v1000_v40  ;;  %v1096_v7 = vmul.f32 0.375, %v1064_v48  ;;  %v922_v1 = vadd.f32 %v840_v39, %v2476_v60 }
 0x1c4   : > { %v1286_v45 = vmul.f32 0.125, %v1254_v53  ;;  %1348 = vst.msk [vmem:[%s2481_s29 + $0x20] sm:$0xff] %vm959_vm5, %v1316_v14  ;;  %v1317_v57 = vadd.f32 %v1285_v54, %v1221_v33  ;;  %v1127_v62 = vadd.f32 %v1095_v58, %v1031_v12  ;;  %v923_v52 = vadd.f32 %v842_v6, %v763_v20  ;;  %v1001_v8 = vld [vmem:[#allocation3 + $0x58] sm:$0xff] }
 0x1c5   : > { %v1287_v15 = vmul.f32 0.125, %v1255_v26  ;;  %v1128_v44 = vadd.f32 %v1096_v7, %v1032_v34  ;;  %v1192_v3 = vmul.f32 0.375, %v1160_v2  ;;  %v1065_v55 = vld [vmem:[#allocation3 + $0x59] sm:$0xff]  ;;  %v1033_v18 = vmul.f32 0.125, %v1001_v8  ;;  %973 = vst.msk [vmem:[#allocation3 + $0x82] sm:$0xff] %vm959_vm5, %v922_v1 }
 0x1c6   : > { %v1318_v35 = vadd.f32 %v1286_v45, %v1222_v51  ;;  %1349 = vst.msk [vmem:[%s2481_s29 + $0x28] sm:$0xff] %vm959_vm5, %v1317_v57  ;;  %v1223_v30 = vadd.f32 %v1191_v29, %v1127_v62  ;;  %v1161_v50 = vld [vmem:[#allocation3 + $0x5a] sm:$0xff]  ;;  %v1097_v5 = vmul.f32 0.375, %v1065_v55  ;;  %974 = vst.msk [vmem:[#allocation3 + $0x8a] sm:$0xff] %vm959_vm5, %v923_v52  ;;  %v844_v60 = vpop.permute.xlu1 %843  ;;  %v846_v56 = vpop.permute.xlu0 %845  ;;  %v1162_v47 = vld [vmem:[#allocation3 + $0x62] sm:$0xff] }
 0x1c7   : > { %v1256_v23 = vld [vmem:[#allocation3 + $0x53] sm:$0xff]  ;;  %v1002_v41 = vld [vmem:[#allocation3 + $0x60] sm:$0xff]  ;;  %v1224_v9 = vadd.f32 %v1192_v3, %v1128_v44  ;;  %v1193_v14 = vmul.f32 0.375, %v1161_v50  ;;  %v1194_v58 = vmul.f32 0.375, %v1162_v47  ;;  %v924_v26 = vadd.f32 %v844_v60, %v2399_v0 }
 0x1c8   : > { %1350 = vst.msk [vmem:[%s2481_s29 + $0x30] sm:$0xff] %vm959_vm5, %v1318_v35  ;;  %v1066_v42 = vld [vmem:[#allocation3 + $0x61] sm:$0xff]  ;;  %v1319_v54 = vadd.f32 %v1287_v15, %v1223_v30  ;;  %v1288_v46 = vmul.f32 0.125, %v1256_v23  ;;  %v1034_v21 = vmul.f32 0.125, %v1002_v41  ;;  %v1129_v33 = vadd.f32 %v1097_v5, %v1033_v18  ;;  %v1067_v51 = vld [vmem:[#allocation3 + $0x69] sm:$0xff] }
 0x1c9   : > { %v1257_v17 = vld [vmem:[#allocation3 + $0x5b] sm:$0xff]  ;;  %v1098_v12 = vmul.f32 0.375, %v1066_v42  ;;  %v1003_v20 = vld [vmem:[#allocation3 + $0x68] sm:$0xff]  ;;  %v925_v45 = vadd.f32 %v846_v56, %v2402_v49  ;;  %v1099_v6 = vmul.f32 0.375, %v1067_v51  ;;  %975 = vst.msk [vmem:[#allocation3 + $0x92] sm:$0xff] %vm959_vm5, %v924_v26 }
 0x1ca   : > { %1351 = vst.msk [vmem:[%s2481_s29 + $0x38] sm:$0xff] %vm959_vm5, %v1319_v54  ;;  %v1320_v53 = vadd.f32 %v1288_v46, %v1224_v9  ;;  %v1289_v40 = vmul.f32 0.125, %v1257_v17  ;;  %v1163_v29 = vld [vmem:[#allocation3 + $0x6a] sm:$0xff]  ;;  %v1225_v48 = vadd.f32 %v1193_v14, %v1129_v33  ;;  %v1035_v39 = vmul.f32 0.125, %v1003_v20  ;;  %v1004_v34 = vld [vmem:[#allocation3 + $0x78] sm:$0xff]  ;;  %v848_v7 = vpop.permute.xlu1 %847  ;;  %v850_v35 = vpop.permute.xlu0 %849 }
 0x1cb   : > { %v1130_v2 = vadd.f32 %v1098_v12, %v1034_v21  ;;  %v1258_v57 = vld [vmem:[#allocation3 + $0x63] sm:$0xff]  ;;  %v1259_v62 = vld [vmem:[#allocation3 + $0x6b] sm:$0xff]  ;;  %v1195_v1 = vmul.f32 0.375, %v1163_v29  ;;  %v1036_v30 = vmul.f32 0.125, %v1004_v34  ;;  %v1068_v15 = vld [vmem:[#allocation3 + $0x79] sm:$0xff]  ;;  %976 = vst.msk [vmem:[#allocation3 + $0xa2] sm:$0xff] %vm959_vm5, %v925_v45  ;;  %v926_v41 = vadd.f32 %v848_v7, %v2405_v16 }
 0x1cc   : > { %1352 = vst.msk [vmem:[%s2481_s29 + $0x40] sm:$0xff] %vm959_vm5, %v1320_v53  ;;  %v1290_v52 = vmul.f32 0.125, %v1258_v57  ;;  %v1164_v44 = vld [vmem:[#allocation3 + $0x7a] sm:$0xff]  ;;  %v1321_v49 = vadd.f32 %v1289_v40, %v1225_v48  ;;  %v1131_v3 = vadd.f32 %v1099_v6, %v1035_v39  ;;  %v1100_v8 = vmul.f32 0.375, %v1068_v15  ;;  %v1165_v23 = vld [vmem:[#allocation3 + $0x82] sm:$0xff] }
 0x1cd   : > { %v1226_v0 = vadd.f32 %v1194_v58, %v1130_v2  ;;  %v1291_v55 = vmul.f32 0.125, %v1259_v62  ;;  %v1196_v50 = vmul.f32 0.375, %v1164_v44  ;;  %v1005_v18 = vld [vmem:[#allocation3 + $0x80] sm:$0xff]  ;;  %v927_v42 = vadd.f32 %v850_v35, %v2408_v4  ;;  %v1006_v21 = vld [vmem:[#allocation3 + $0x88] sm:$0xff]  ;;  %977 = vst.msk [vmem:[#allocation3 + $0xaa] sm:$0xff] %vm959_vm5, %v926_v41 }
 0x1ce   : > { %v1069_v5 = vld [vmem:[#allocation3 + $0x81] sm:$0xff]  ;;  %1353 = vst.msk [vmem:[%s2481_s29 + $0x48] sm:$0xff] %vm959_vm5, %v1321_v49  ;;  %v1227_v60 = vadd.f32 %v1195_v1, %v1131_v3  ;;  %v1132_v54 = vadd.f32 %v1100_v8, %v1036_v30  ;;  %v1037_v9 = vmul.f32 0.125, %v1005_v18  ;;  %v1070_v47 = vld [vmem:[#allocation3 + $0x89] sm:$0xff]  ;;  %v852_v17 = vpop.permute.xlu1 %851  ;;  %v854_v33 = vpop.permute.xlu0 %853  ;;  %v1038_v58 = vmul.f32 0.125, %v1006_v21 }
 0x1cf   : > { %v1322_v56 = vadd.f32 %v1290_v52, %v1226_v0  ;;  %v1260_v46 = vld [vmem:[#allocation3 + $0x7b] sm:$0xff]  ;;  %v1101_v14 = vmul.f32 0.375, %v1069_v5  ;;  %v1166_v53 = vld [vmem:[#allocation3 + $0x8a] sm:$0xff]  ;;  %978 = vst.msk [vmem:[#allocation3 + $0xb2] sm:$0xff] %vm959_vm5, %v927_v42  ;;  %v2525_v16 = vadd.f32 %v2434_v27, %v2358_v24  ;;  %v1102_v20 = vmul.f32 0.375, %v1070_v47 }
 0x1d0   : > { %v1292_v12 = vmul.f32 0.125, %v1260_v46  ;;  %v1323_v4 = vadd.f32 %v1291_v55, %v1227_v60  ;;  %v1228_v40 = vadd.f32 %v1196_v50, %v1132_v54  ;;  %v1261_v51 = vld [vmem:[#allocation3 + $0x83] sm:$0xff]  ;;  %v1197_v26 = vmul.f32 0.375, %v1165_v23  ;;  %v1007_v6 = vld [vmem:[#allocation3 + $0x90] sm:$0xff] }
 0x1d1   : > { %1354 = vst.msk [vmem:[%s2481_s29 + $0x50] sm:$0xff] %vm959_vm5, %v1322_v56  ;;  %v1133_v29 = vadd.f32 %v1101_v14, %v1037_v9  ;;  %v928_v45 = vadd.f32 %v852_v17, %v2411_v63  ;;  %v929_v48 = vadd.f32 %v854_v33, %v2414_v22  ;;  %v2533_v2 = vadd.f32 %v2436_v31, %v2360_v10  ;;  %v1071_v57 = vld [vmem:[#allocation3 + $0x91] sm:$0xff] }
 0x1d2   : > { %1355 = vst.msk [vmem:[%s2481_s29 + $0x58] sm:$0xff] %vm959_vm5, %v1323_v4  ;;  %v1324_v24 = vadd.f32 %v1292_v12, %v1228_v40  ;;  %v1134_v27 = vadd.f32 %v1102_v20, %v1038_v58  ;;  %v1198_v39 = vmul.f32 0.375, %v1166_v53  ;;  %v1167_v62 = vld [vmem:[#allocation3 + $0x92] sm:$0xff]  ;;  %v856_v34 = vpop.permute.xlu1 %855  ;;  %v858_v7 = vpop.permute.xlu0 %857  ;;  %v1293_v1 = vmul.f32 0.125, %v1261_v51  ;;  %v1008_v15 = vld [vmem:[#allocation3 + $0xa0] sm:$0xff] }
 0x1d3   : > { %v1229_v35 = vadd.f32 %v1197_v26, %v1133_v29  ;;  %v1039_v63 = vmul.f32 0.125, %v1007_v6  ;;  %v1103_v52 = vmul.f32 0.375, %v1071_v57  ;;  %v1262_v22 = vld [vmem:[#allocation3 + $0x8b] sm:$0xff]  ;;  %v1263_v30 = vld [vmem:[#allocation3 + $0x93] sm:$0xff]  ;;  %979 = vst.msk [vmem:[#allocation3 + $0xba] sm:$0xff] %vm959_vm5, %v928_v45  ;;  %980 = vst.msk [vmem:[#allocation3 + $0xca] sm:$0xff] %vm959_vm5, %v929_v48  ;;  %v930_v56 = vadd.f32 %v856_v34, %v2417_v13 }
 0x1d4   : > { %1356 = vst.msk [vmem:[%s2481_s29 + $0x60] sm:$0xff] %vm959_vm5, %v1324_v24  ;;  %v1230_v10 = vadd.f32 %v1198_v39, %v1134_v27  ;;  %v1199_v31 = vmul.f32 0.375, %v1167_v62  ;;  %v1294_v44 = vmul.f32 0.125, %v1262_v22  ;;  %v1040_v0 = vmul.f32 0.125, %v1008_v15  ;;  %v1072_v49 = vld [vmem:[#allocation3 + $0xa1] sm:$0xff]  ;;  %v1073_v42 = vld [vmem:[#allocation3 + $0xa9] sm:$0xff] }
 0x1d5   : > { %v1168_v3 = vld [vmem:[#allocation3 + $0xa2] sm:$0xff]  ;;  %v1325_v8 = vadd.f32 %v1293_v1, %v1229_v35  ;;  %v1135_v55 = vadd.f32 %v1103_v52, %v1039_v63  ;;  %v1295_v50 = vmul.f32 0.125, %v1263_v30  ;;  %v1104_v18 = vmul.f32 0.375, %v1072_v49  ;;  %v1169_v60 = vld [vmem:[#allocation3 + $0xaa] sm:$0xff]  ;;  %981 = vst.msk [vmem:[#allocation3 + $0xd2] sm:$0xff] %vm959_vm5, %v930_v56 }
 0x1d6   : > { %v1326_v5 = vadd.f32 %v1294_v44, %v1230_v10  ;;  %v1200_v23 = vmul.f32 0.375, %v1168_v3  ;;  %v1009_v41 = vld [vmem:[#allocation3 + $0xa8] sm:$0xff]  ;;  %v931_v54 = vadd.f32 %v858_v7, %v2420_v11  ;;  %v860_v9 = vpop.permute.xlu1 %859  ;;  %v862_v46 = vpop.permute.xlu0 %861  ;;  %v1105_v33 = vmul.f32 0.375, %v1073_v42  ;;  %v1010_v12 = vld [vmem:[#allocation3 + $0xb0] sm:$0xff] }
 0x1d7   : > { %1357 = vst.msk [vmem:[%s2481_s29 + $0x68] sm:$0xff] %vm959_vm5, %v1325_v8  ;;  %v1231_v21 = vadd.f32 %v1199_v31, %v1135_v55  ;;  %v1136_v47 = vadd.f32 %v1104_v18, %v1040_v0  ;;  %v1041_v17 = vmul.f32 0.125, %v1009_v41  ;;  %v1264_v14 = vld [vmem:[#allocation3 + $0xa3] sm:$0xff]  ;;  %v1074_v58 = vld [vmem:[#allocation3 + $0xb1] sm:$0xff]  ;;  %v1201_v53 = vmul.f32 0.375, %v1169_v60 }
 0x1d8   : > { %1358 = vst.msk [vmem:[%s2481_s29 + $0x70] sm:$0xff] %vm959_vm5, %v1326_v5  ;;  %v1296_v4 = vmul.f32 0.125, %v1264_v14  ;;  %v1042_v40 = vmul.f32 0.125, %v1010_v12  ;;  %v1106_v20 = vmul.f32 0.375, %v1074_v58  ;;  %v1170_v13 = vld [vmem:[#allocation3 + $0xb2] sm:$0xff]  ;;  %982 = vst.msk [vmem:[#allocation3 + $0xda] sm:$0xff] %vm959_vm5, %v931_v54  ;;  %v932_v57 = vadd.f32 %v860_v9, %v2423_v19 }
 0x1d9   : > { %v1265_v51 = vld [vmem:[#allocation3 + $0xab] sm:$0xff]  ;;  %v1327_v11 = vadd.f32 %v1295_v50, %v1231_v21  ;;  %v1232_v29 = vadd.f32 %v1200_v23, %v1136_v47  ;;  %v1137_v26 = vadd.f32 %v1105_v33, %v1041_v17  ;;  %v1202_v45 = vmul.f32 0.375, %v1170_v13 }
 0x1da   : > { %v1138_v48 = vadd.f32 %v1106_v20, %v1042_v40  ;;  %v1297_v24 = vmul.f32 0.125, %v1265_v51  ;;  %v1011_v27 = vld [vmem:[#allocation3 + $0xb8] sm:$0xff]  ;;  %v933_v62 = vadd.f32 %v862_v46, %v2426_v36  ;;  %v864_v34 = vpop.permute.xlu1 %863  ;;  %v866_v7 = vpop.permute.xlu0 %865  ;;  %v1012_v15 = vld [vmem:[#allocation3 + $0xc8] sm:$0xff]  ;;  %983 = vst.msk [vmem:[#allocation3 + $0xe2] sm:$0xff] %vm959_vm5, %v932_v57  ;;  %v778_v17 = vadd.f32 %v2438_v43, %v2366_v38 }
 0x1db   : > { %v1075_v39 = vld [vmem:[#allocation3 + $0xb9] sm:$0xff]  ;;  %1359 = vst.msk [vmem:[%s2481_s29 + $0x78] sm:$0xff] %vm959_vm5, %v1327_v11  ;;  %v1233_v35 = vadd.f32 %v1201_v53, %v1137_v26  ;;  %v1328_v1 = vadd.f32 %v1296_v4, %v1232_v29  ;;  %v1043_v63 = vmul.f32 0.125, %v1011_v27  ;;  %v1076_v19 = vld [vmem:[#allocation3 + $0xc9] sm:$0xff]  ;;  %v1044_v8 = vmul.f32 0.125, %v1012_v15 }
 0x1dc   : > { %v1171_v6 = vld [vmem:[#allocation3 + $0xba] sm:$0xff]  ;;  %v1107_v52 = vmul.f32 0.375, %v1075_v39  ;;  %v1234_v10 = vadd.f32 %v1202_v45, %v1138_v48  ;;  %v1172_v49 = vld [vmem:[#allocation3 + $0xca] sm:$0xff]  ;;  %984 = vst.msk [vmem:[#allocation3 + $0xf2] sm:$0xff] %vm959_vm5, %v933_v62  ;;  %v1108_v55 = vmul.f32 0.375, %v1076_v19  ;;  %v934_v5 = vadd.f32 %v864_v34, %v2429_v25  ;;  %v1173_v46 = vld [vmem:[#allocation3 + $0xd2] sm:$0xff] }
 0x1dd   : > { %v1266_v22 = vld [vmem:[#allocation3 + $0xb3] sm:$0xff]  ;;  %v1267_v30 = vld [vmem:[#allocation3 + $0xbb] sm:$0xff]  ;;  %v1203_v31 = vmul.f32 0.375, %v1171_v6  ;;  %1360 = vst.msk [vmem:[%s2481_s29 + $0x80] sm:$0xff] %vm959_vm5, %v1328_v1  ;;  %v1329_v36 = vadd.f32 %v1297_v24, %v1233_v35  ;;  %v1204_v18 = vmul.f32 0.375, %v1172_v49  ;;  %v935_v23 = vadd.f32 %v866_v7, %v2432_v32  ;;  %v1268_v14 = vld [vmem:[#allocation3 + $0xcb] sm:$0xff] }
 0x1de   : > { %v1298_v44 = vmul.f32 0.125, %v1266_v22  ;;  %v1299_v0 = vmul.f32 0.125, %v1267_v30  ;;  %v1139_v3 = vadd.f32 %v1107_v52, %v1043_v63  ;;  %v868_v41 = vpop.permute.xlu1 %867  ;;  %v870_v42 = vpop.permute.xlu0 %869  ;;  %v1140_v56 = vadd.f32 %v1108_v55, %v1044_v8  ;;  %v1013_v54 = vld [vmem:[#allocation3 + $0xd0] sm:$0xff]  ;;  %985 = vst.msk [vmem:[#allocation3 + $0xfa] sm:$0xff] %vm959_vm5, %v934_v5 }
 0x1df   : > { %1361 = vst.msk [vmem:[%s2481_s29 + $0x88] sm:$0xff] %vm959_vm5, %v1329_v36  ;;  %v1077_v9 = vld [vmem:[#allocation3 + $0xd1] sm:$0xff]  ;;  %v936_v21 = vadd.f32 %v868_v41, %v2525_v16  ;;  %v937_v47 = vadd.f32 %v870_v42, %v2533_v2  ;;  %v779_v25 = vadd.f32 %v2440_v61, %v2368_v28  ;;  %v1045_v32 = vmul.f32 0.125, %v1013_v54  ;;  %v1078_v58 = vld [vmem:[#allocation3 + $0xd9] sm:$0xff]  ;;  %986 = vst.msk [vmem:[#allocation3 + $0x102] sm:$0xff] %vm959_vm5, %v935_v23 }
 0x1e0   : > { %v1330_v50 = vadd.f32 %v1298_v44, %v1234_v10  ;;  %v1235_v60 = vadd.f32 %v1203_v31, %v1139_v3  ;;  %v1109_v33 = vmul.f32 0.375, %v1077_v9  ;;  %v1014_v12 = vld [vmem:[#allocation3 + $0xd8] sm:$0xff]  ;;  %v1236_v2 = vadd.f32 %v1204_v18, %v1140_v56 }
 0x1e1   : > { %v1300_v53 = vmul.f32 0.125, %v1268_v14  ;;  %v1046_v4 = vmul.f32 0.125, %v1014_v12  ;;  %v1174_v38 = vld [vmem:[#allocation3 + $0xda] sm:$0xff]  ;;  %987 = vst.msk [vmem:[#allocation3 + $0x10a] sm:$0xff] %vm959_vm5, %v936_v21  ;;  %988 = vst.msk [vmem:[#allocation3 + $0x11a] sm:$0xff] %vm959_vm5, %v937_v47  ;;  %v1205_v61 = vmul.f32 0.375, %v1173_v46  ;;  %v780_v1 = vadd.f32 %v2443_v37, %v2373_v59 }
 0x1e2   : > { %1362 = vst.msk [vmem:[%s2481_s29 + $0x90] sm:$0xff] %vm959_vm5, %v1330_v50  ;;  %v1331_v16 = vadd.f32 %v1299_v0, %v1235_v60  ;;  %v1269_v43 = vld [vmem:[#allocation3 + $0xd3] sm:$0xff]  ;;  %v1141_v28 = vadd.f32 %v1109_v33, %v1045_v32  ;;  %v1110_v40 = vmul.f32 0.375, %v1078_v58  ;;  %v1206_v20 = vmul.f32 0.375, %v1174_v38  ;;  %v872_v13 = vpop.permute.xlu1 %871  ;;  %v874_v51 = vpop.permute.xlu0 %873  ;;  %v1015_v26 = vld [vmem:[#allocation3 + $0xe0] sm:$0xff] }
 0x1e3   : > { %v1332_v11 = vadd.f32 %v1300_v53, %v1236_v2  ;;  %v1301_v29 = vmul.f32 0.125, %v1269_v43  ;;  %v1079_v45 = vld [vmem:[#allocation3 + $0xe1] sm:$0xff]  ;;  %v938_v24 = vadd.f32 %v872_v13, %v778_v17  ;;  %v939_v27 = vadd.f32 %v874_v51, %v779_v25  ;;  %v1016_v35 = vld [vmem:[#allocation3 + $0xf0] sm:$0xff] }
 0x1e4   : > { %1363 = vst.msk [vmem:[%s2481_s29 + $0x98] sm:$0xff] %vm959_vm5, %v1331_v16  ;;  %v1175_v48 = vld [vmem:[#allocation3 + $0xe2] sm:$0xff]  ;;  %v1237_v39 = vadd.f32 %v1205_v61, %v1141_v28  ;;  %v1142_v6 = vadd.f32 %v1110_v40, %v1046_v4  ;;  %v1047_v57 = vmul.f32 0.125, %v1015_v26  ;;  %v1111_v62 = vmul.f32 0.375, %v1079_v45  ;;  %v1080_v30 = vld [vmem:[#allocation3 + $0xf1] sm:$0xff] }
 0x1e5   : > { %v1270_v34 = vld [vmem:[#allocation3 + $0xdb] sm:$0xff]  ;;  %v1271_v7 = vld [vmem:[#allocation3 + $0xe3] sm:$0xff]  ;;  %1364 = vst.msk [vmem:[%s2481_s29 + $0xa0] sm:$0xff] %vm959_vm5, %v1332_v11  ;;  %v1207_v63 = vmul.f32 0.375, %v1175_v48  ;;  %v1048_v22 = vmul.f32 0.125, %v1016_v35  ;;  %v1176_v15 = vld [vmem:[#allocation3 + $0xf2] sm:$0xff] }
 0x1e6   : > { %v1302_v52 = vmul.f32 0.125, %v1270_v34  ;;  %989 = vst.msk [vmem:[#allocation3 + $0x122] sm:$0xff] %vm959_vm5, %v938_v24  ;;  %990 = vst.msk [vmem:[#allocation3 + $0x12a] sm:$0xff] %vm959_vm5, %v939_v27  ;;  %v1238_v10 = vadd.f32 %v1206_v20, %v1142_v6  ;;  %v1333_v31 = vadd.f32 %v1301_v29, %v1237_v39  ;;  %v1143_v44 = vadd.f32 %v1111_v62, %v1047_v57  ;;  %v876_v19 = vpop.permute.xlu1 %875  ;;  %v1017_v59 = vld [vmem:[#allocation3 + $0xf8] sm:$0xff]  ;;  %v1018_v41 = vld [vmem:[#allocation3 + $0x100] sm:$0xff] }
 0x1e7   : > { %v1112_v0 = vmul.f32 0.375, %v1080_v30  ;;  %v1303_v49 = vmul.f32 0.125, %v1271_v7  ;;  %v1208_v36 = vmul.f32 0.375, %v1176_v15  ;;  %v1081_v37 = vld [vmem:[#allocation3 + $0xf9] sm:$0xff]  ;;  %v940_v8 = vadd.f32 %v876_v19, %v780_v1  ;;  %v1082_v42 = vld [vmem:[#allocation3 + $0x101] sm:$0xff] }
 0x1e8   : > { %v1177_v3 = vld [vmem:[#allocation3 + $0xfa] sm:$0xff]  ;;  %1365 = vst.msk [vmem:[%s2481_s29 + $0xa8] sm:$0xff] %vm959_vm5, %v1333_v31  ;;  %v1239_v55 = vadd.f32 %v1207_v63, %v1143_v44  ;;  %v1334_v50 = vadd.f32 %v1302_v52, %v1238_v10  ;;  %v1049_v5 = vmul.f32 0.125, %v1017_v59  ;;  %v1113_v60 = vmul.f32 0.375, %v1081_v37  ;;  %v1178_v9 = vld [vmem:[#allocation3 + $0x102] sm:$0xff]  ;;  %v1179_v14 = vld [vmem:[#allocation3 + $0x10a] sm:$0xff] }
 0x1e9   : > { %v1144_v18 = vadd.f32 %v1112_v0, %v1048_v22  ;;  %v1272_v23 = vld [vmem:[#allocation3 + $0xf3] sm:$0xff]  ;;  %v1050_v54 = vmul.f32 0.125, %v1018_v41  ;;  %v1273_v46 = vld [vmem:[#allocation3 + $0xfb] sm:$0xff]  ;;  %991 = vst.msk [vmem:[#allocation3 + $0x132] sm:$0xff] %vm959_vm5, %v940_v8  ;;  %v1209_v17 = vmul.f32 0.375, %v1177_v3  ;;  %v1114_v25 = vmul.f32 0.375, %v1082_v42 }
 0x1ea   : > { %v1304_v56 = vmul.f32 0.125, %v1272_v23  ;;  %v1335_v21 = vadd.f32 %v1303_v49, %v1239_v55  ;;  %1366 = vst.msk [vmem:[%s2481_s29 + $0xb0] sm:$0xff] %vm959_vm5, %v1334_v50  ;;  %v1019_v32 = vld [vmem:[#allocation3 + $0x108] sm:$0xff]  ;;  %v1145_v12 = vadd.f32 %v1113_v60, %v1049_v5  ;;  %v1210_v58 = vmul.f32 0.375, %v1178_v9  ;;  %v1020_v38 = vld [vmem:[#allocation3 + $0x118] sm:$0xff] }
 0x1eb   : > { %v1240_v47 = vadd.f32 %v1208_v36, %v1144_v18  ;;  %v1083_v33 = vld [vmem:[#allocation3 + $0x109] sm:$0xff]  ;;  %v1051_v16 = vmul.f32 0.125, %v1019_v32  ;;  %v1146_v28 = vadd.f32 %v1114_v25, %v1050_v54  ;;  %v1305_v61 = vmul.f32 0.125, %v1273_v46  ;;  %v1084_v20 = vld [vmem:[#allocation3 + $0x119] sm:$0xff] }
 0x1ec   : > { %v1115_v2 = vmul.f32 0.375, %v1083_v33  ;;  %v1274_v53 = vld [vmem:[#allocation3 + $0x103] sm:$0xff]  ;;  %v1275_v4 = vld [vmem:[#allocation3 + $0x10b] sm:$0xff]  ;;  %1367 = vst.msk [vmem:[%s2481_s29 + $0xb8] sm:$0xff] %vm959_vm5, %v1335_v21  ;;  %v1180_v13 = vld [vmem:[#allocation3 + $0x11a] sm:$0xff]  ;;  %v1241_v11 = vadd.f32 %v1209_v17, %v1145_v12  ;;  %v1211_v26 = vmul.f32 0.375, %v1179_v14 }
 0x1ed   : > { %v1336_v43 = vadd.f32 %v1304_v56, %v1240_v47  ;;  %v1306_v40 = vmul.f32 0.125, %v1274_v53  ;;  %v1021_v51 = vld [vmem:[#allocation3 + $0x120] sm:$0xff]  ;;  %v1052_v45 = vmul.f32 0.125, %v1020_v38  ;;  %v1242_v27 = vadd.f32 %v1210_v58, %v1146_v28  ;;  %v1022_v34 = vld [vmem:[#allocation3 + $0x128] sm:$0xff] }
 0x1ee   : > { %v1147_v29 = vadd.f32 %v1115_v2, %v1051_v16  ;;  %v1085_v48 = vld [vmem:[#allocation3 + $0x121] sm:$0xff]  ;;  %v1307_v39 = vmul.f32 0.125, %v1275_v4  ;;  %v1116_v6 = vmul.f32 0.375, %v1084_v20  ;;  %v1053_v57 = vmul.f32 0.125, %v1021_v51  ;;  %v1086_v7 = vld [vmem:[#allocation3 + $0x129] sm:$0xff] }
 0x1ef   : > { %v1276_v24 = vld [vmem:[#allocation3 + $0x11b] sm:$0xff]  ;;  %1368 = vst.msk [vmem:[%s2481_s29 + $0xc0] sm:$0xff] %vm959_vm5, %v1336_v43  ;;  %v1337_v35 = vadd.f32 %v1305_v61, %v1241_v11  ;;  %v1212_v63 = vmul.f32 0.375, %v1180_v13  ;;  %v1117_v52 = vmul.f32 0.375, %v1085_v48  ;;  %v1182_v22 = vld [vmem:[#allocation3 + $0x12a] sm:$0xff]  ;;  %v1338_v30 = vadd.f32 %v1306_v40, %v1242_v27 }
 0x1f0   : > { %v1181_v62 = vld [vmem:[#allocation3 + $0x122] sm:$0xff]  ;;  %v1243_v1 = vadd.f32 %v1211_v26, %v1147_v29  ;;  %v1148_v15 = vadd.f32 %v1116_v6, %v1052_v45  ;;  %v1308_v10 = vmul.f32 0.125, %v1276_v24  ;;  %v1054_v31 = vmul.f32 0.125, %v1022_v34  ;;  %v1023_v0 = vld [vmem:[#allocation3 + $0x130] sm:$0xff] }
 0x1f1   : > { %v1277_v44 = vld [vmem:[#allocation3 + $0x123] sm:$0xff]  ;;  %v1087_v19 = vld [vmem:[#allocation3 + $0x131] sm:$0xff]  ;;  %1369 = vst.msk [vmem:[%s2481_s29 + $0xc8] sm:$0xff] %vm959_vm5, %v1337_v35  ;;  %v1149_v36 = vadd.f32 %v1117_v52, %v1053_v57  ;;  %v1213_v59 = vmul.f32 0.375, %v1181_v62  ;;  %v1118_v37 = vmul.f32 0.375, %v1086_v7  ;;  %1370 = vst.msk [vmem:[%s2481_s29 + $0xd0] sm:$0xff] %vm959_vm5, %v1338_v30 }
 0x1f2   : > { %v1339_v49 = vadd.f32 %v1307_v39, %v1243_v1  ;;  %v1183_v3 = vld [vmem:[#allocation3 + $0x132] sm:$0xff]  ;;  %v1244_v55 = vadd.f32 %v1212_v63, %v1148_v15  ;;  %v1214_v50 = vmul.f32 0.375, %v1182_v22  ;;  %v1055_v18 = vmul.f32 0.125, %v1023_v0 }
 0x1f3   : > { %v1278_v8 = vld [vmem:[#allocation3 + $0x12b] sm:$0xff]  ;;  %v1119_v5 = vmul.f32 0.375, %v1087_v19  ;;  %v1245_v23 = vadd.f32 %v1213_v59, %v1149_v36  ;;  %v1150_v41 = vadd.f32 %v1118_v37, %v1054_v31  ;;  %v1309_v42 = vmul.f32 0.125, %v1277_v44  ;;  %v1279_v60 = vld [vmem:[#allocation3 + $0x133] sm:$0xff] }
 0x1f4   : > { %1371 = vst.msk [vmem:[%s2481_s29 + $0xd8] sm:$0xff] %vm959_vm5, %v1339_v49  ;;  %v1310_v56 = vmul.f32 0.125, %v1278_v8  ;;  %v1340_v54 = vadd.f32 %v1308_v10, %v1244_v55  ;;  %v1215_v46 = vmul.f32 0.375, %v1183_v3  ;;  %v1311_v25 = vmul.f32 0.125, %v1279_v60 }
 0x1f5   : > { %v1151_v9 = vadd.f32 %v1119_v5, %v1055_v18  ;;  %v1246_v21 = vadd.f32 %v1214_v50, %v1150_v41  ;;  %v1341_v47 = vadd.f32 %v1309_v42, %v1245_v23 }
 0x1f6   : > { %1372 = vst.msk [vmem:[%s2481_s29 + $0xe0] sm:$0xff] %vm959_vm5, %v1340_v54 }
 0x1f7   : > { %v1247_v17 = vadd.f32 %v1215_v46, %v1151_v9  ;;  %1373 = vst.msk [vmem:[%s2481_s29 + $0xe8] sm:$0xff] %vm959_vm5, %v1341_v47  ;;  %v1342_v32 = vadd.f32 %v1310_v56, %v1246_v21 }
 0x1f9   : > { %v1343_v33 = vadd.f32 %v1311_v25, %v1247_v17  ;;  %1374 = vst.msk [vmem:[%s2481_s29 + $0xf0] sm:$0xff] %vm959_vm5, %v1342_v32 }
 0x1fb   : > { %1375 = vst.msk [vmem:[%s2481_s29 + $0xf8] sm:$0xff] %vm959_vm5, %v1343_v33 }
 0x1fc   : > { %1580 = shalt.err (!%p1577_p9)
}
 0x1fd   : > { %s1581_s21 = scalar_lea.hbm %s2605_s11, 4096  ;;  %s1585_s26 = scalar_lea.hbm %s2654_s1, 16384 }
 0x1fe   : > { %p1582_p13 = scmp.ne.s32.totalorder %s2605_s11, %s1581_s21  ;;  %p1586_p2 = scmp.lt.s32.totalorder %s2605_s11, %s2654_s1 }
 0x1ff   : > { %p1587_p3 = scmp.lt.s32.totalorder %s1585_s26, %s1581_s21 }
 0x200   : > { %p1583_p1 = pnand %p1582_p13, %p2666_p11 }
 0x201   : > { %p1588_p6 = por %p1587_p3, %p1586_p2 }
 0x202   : > { %p1584_p0 = pneg %p1583_p1 }
 0x204   : > { %p1589_p10 = pnand %p1588_p6, %p1584_p0 }
 0x206   : > { %1592 = shalt.err (!%p1589_p10)
}
 0x207   : > { %s1642_s25 = smov 128   ;;  %s1643_s27 = smov 8  }
 0x208   : > { %1486 = dma.vmem_to_hbm [thread:$0]  (%p2666_p11), %s2607_s3, 4096, %s2605_s11, %s1377_s10, %s1642_s25, %s1642_s25, %s1643_s27  }
 0x209 PF: > { %p1497_p12 = scmp.ge.s32.totalorder %s1631_s9, 2  ;;  %s1406_s28 = sand.u32 1, %s1619_s6  }
 0x20a   : > { %p2667_p4 = scmp.ne.s32.totalorder %s2662_s19, 0  ;;  %s1407_s29 = scalar_lea.sflag [#allocation6], %s1406_s28 }
 0x20c   : > { %p1493_p5 = pnand %p1497_p12, %p2667_p4 }
 0x20e   : > { %p1494_p7 = pneg %p1493_p5 }
 0x210   : > { %1614 = dma.done.wait (%p1494_p7), %s1407_s29, 4096  }
 0x211   : > { %1616 = vsyncadd (%p1494_p7), %s1407_s29, 4294963200  ;;  %p14_p8 = scmp.ge.s32.totalorder %s1679_s12, 6   ;;  %s2668_s6 = smov %s1623_s7 }
 0x212   : > { %s2669_s7 = smov %s1627_s8  ;;  %s2670_s8 = smov %s1691_s15 }
 0x213   : > { %s2671_s9 = smov %s1679_s12  ;;  %16 = sbr.rel (!%p14_p8) target bundleno = 5 (0x5), region = 69 }
 0x218   :  { %1412 = vsyncpa [#allocation5], 1 }
 0x219   :  { %1414 = vsyncpa [#allocation5 + $0x1], 1 }
 0x21a   :  { %1415 = vsyncpa [#allocation6], 1 }
 0x21b   :  { %1417 = vsyncpa [#allocation6 + $0x1], 1 }

</bundles_post_ra>
